<compile_context>
chip_gen: v7x
topology: tpu7x:2x2x1
jax: 0.10.0
libtpu: 0.0.40
codegen_flags: <defaults>
</compile_context>

<pallas_src>
import jax
import jax.numpy as jnp
from jax.experimental import pallas as pl
from jax.experimental.pallas import tpu as pltpu


_LANE = 128   # lane width / min unmasked store width
_TM = 128     # batch tile (rows per grid step)


def _round_up(x, m):
    return ((x + m - 1) // m) * m


# ----------------------------------------------------------------------------
# Pallas kernel: full MLP + LayerNorm + Tanh fused for one batch tile.
# Matmuls hit the MXU (bf16 in, f32 acc), LayerNorm reduction is XLU,
# rsqrt/tanh go to the EUP; everything post-matmul stays in f32 (v5e has no
# bf16 VPU/EUP).
# ----------------------------------------------------------------------------
def _make_encoder_kernel(n_linear, eps, latent, latent_pad):
    def kernel(*refs):
        # refs = x, (w0, b0), (w1, b1), ..., gamma, beta, out
        x_ref = refs[0]
        gamma_ref = refs[1 + 2 * n_linear]
        beta_ref = refs[2 + 2 * n_linear]
        out_ref = refs[3 + 2 * n_linear]

        x = x_ref[...]                                   # (TM, D_in) bf16
        for i in range(n_linear):
            w = refs[1 + 2 * i][...]                     # (D_i, D_{i+1}) bf16
            b = refs[2 + 2 * i][...]                     # (1, D_{i+1})  f32
            y = jnp.dot(x, w, preferred_element_type=jnp.float32) + b
            if i < n_linear - 1:                         # ReLU between layers
                x = jnp.maximum(y, 0.0).astype(jnp.bfloat16)
            else:
                x = y                                    # f32 for LayerNorm

        # LayerNorm over the real latent columns only (padded columns of the
        # last Linear are exactly zero because W/b were zero-padded), torch
        # default eps=1e-5.
        inv_n = jnp.float32(1.0 / latent)
        mean = jnp.sum(x, axis=-1, keepdims=True) * inv_n
        cen = x - mean
        if latent_pad != latent:
            col = jax.lax.broadcasted_iota(jnp.int32, x.shape, 1)
            cen_m = jnp.where(col < latent, cen, 0.0)
        else:
            cen_m = cen
        var = jnp.sum(cen_m * cen_m, axis=-1, keepdims=True) * inv_n
        xn = cen * jax.lax.rsqrt(var + eps)
        # gamma/beta are zero-padded, so padded output columns come out as 0.
        y = xn * gamma_ref[...] + beta_ref[...]
        out_ref[...] = jnp.tanh(y)                       # (TM, latent_pad) f32

    return kernel


def encoder_forward(x, params, latent_size, *, tm=_TM):
    """Runs the Encoder forward pass.

    x      : (B, C, H, W) float32, or a single unbatched (C, H, W) observation
    params : dict with 'weights' [(in_i, out_i)], 'biases' [(out_i,)],
             'gamma' (latent,), 'beta' (latent,)
    """
    squeeze_out = x.ndim == 3                 # X.dim() == 1 after flatten in torch
    if squeeze_out:
        x = x[None]                           # unsqueeze(0)
    B = x.shape[0]
    x_flat = x.reshape(B, -1)                 # HybridInputModule: flatten

    weights = params["weights"]
    biases = params["biases"]
    n_linear = len(weights)
    d_in = x_flat.shape[1]

    latent_pad = _round_up(max(latent_size, _LANE), _LANE)
    b_pad = _round_up(max(B, 1), tm)

    # Batch padded to the tile size; matmul operands cast to bf16.
    x_p = jnp.pad(x_flat.astype(jnp.bfloat16), ((0, b_pad - B), (0, 0)))

    operands = [x_p]
    for i, (w, b) in enumerate(zip(weights, biases)):
        w = w.astype(jnp.float32)
        b = b.astype(jnp.float32)
        if i == n_linear - 1 and latent_pad != latent_size:
            w = jnp.pad(w, ((0, 0), (0, latent_pad - latent_size)))
            b = jnp.pad(b, ((0, latent_pad - latent_size),))
        operands.append(w.astype(jnp.bfloat16))
        operands.append(b.reshape(1, -1))
    gamma = jnp.pad(params["gamma"].astype(jnp.float32),
                    (0, latent_pad - latent_size)).reshape(1, -1)
    beta = jnp.pad(params["beta"].astype(jnp.float32),
                   (0, latent_pad - latent_size)).reshape(1, -1)
    operands.append(gamma)
    operands.append(beta)

    # BlockSpecs: x / out are tiled over the batch grid; every weight / bias /
    # gamma / beta gets a constant index_map so it is fetched once and stays
    # resident in VMEM across grid steps.
    in_specs = [pl.BlockSpec((tm, d_in), lambda i: (i, 0))]
    for op in operands[1:]:
        in_specs.append(pl.BlockSpec(op.shape, lambda i: (0, 0)))
    out_spec = pl.BlockSpec((tm, latent_pad), lambda i: (i, 0))

    kernel = _make_encoder_kernel(n_linear, eps=1e-5,
                                  latent=latent_size, latent_pad=latent_pad)

    out = pl.pallas_call(
        kernel,
        out_shape=jax.ShapeDtypeStruct((b_pad, latent_pad), jnp.float32),
        grid_spec=pltpu.PrefetchScalarGridSpec(
            num_scalar_prefetch=0,
            grid=(b_pad // tm,),
            in_specs=in_specs,
            out_specs=out_spec,
        ),
        compiler_params=pltpu.CompilerParams(
            dimension_semantics=("parallel",)),
    )(*operands)

    out = out[:B, :latent_size]
    if squeeze_out:
        out = out.reshape(latent_size)        # out_shape = (self.n,)
    return out


# ----------------------------------------------------------------------------
# Deterministic parameter construction (synthetic init, no checkpoint load).
# ----------------------------------------------------------------------------
def init_encoder_params(key, layer_sizes):
    weights, biases = [], []
    for i in range(len(layer_sizes) - 1):
        key, kw, kb = jax.random.split(key, 3)
        fan_in = layer_sizes[i]
        bound = 1.0 / jnp.sqrt(fan_in)
        weights.append(
            jax.random.uniform(kw, (layer_sizes[i], layer_sizes[i + 1]),
                               jnp.float32, -bound, bound))
        biases.append(
            jax.random.uniform(kb, (layer_sizes[i + 1],), jnp.float32,
                               -bound, bound))
    latent = layer_sizes[-1]
    return {
        "weights": weights,
        "biases": biases,
        "gamma": jnp.ones((latent,), jnp.float32),   # torch LayerNorm init
        "beta": jnp.zeros((latent,), jnp.float32),
    }


# Pure-JAX references for correctness checking.
def _reference_forward(x, params, latent_size, bf16_matmul=False):
    squeeze_out = x.ndim == 3
    if squeeze_out:
        x = x[None]
    h = x.reshape(x.shape[0], -1).astype(jnp.float32)
    n = len(params["weights"])
    for i, (w, b) in enumerate(zip(params["weights"], params["biases"])):
        if bf16_matmul:
            h = jnp.dot(h.astype(jnp.bfloat16), w.astype(jnp.bfloat16),
                        preferred_element_type=jnp.float32) + b
        else:
            h = h @ w + b
        if i < n - 1:
            h = jnp.maximum(h, 0.0)
    mean = jnp.mean(h, axis=-1, keepdims=True)
    var = jnp.mean((h - mean) ** 2, axis=-1, keepdims=True)
    h = (h - mean) / jnp.sqrt(var + 1e-5)
    h = jnp.tanh(h * params["gamma"] + params["beta"])
    return h.reshape(latent_size) if squeeze_out else h


if __name__ == "__main__":
    key = jax.random.PRNGKey(0)
    k_x, k_p = jax.random.split(key)

    # Observation (C=4, H=16, W=16) -> in_net.n = 1024,
    # hidden_layer_sizes = [128], latent_size = 32.  Batch = 256 so the batch
    # grid (TM=128 -> 2 steps) and weight residency are actually exercised.
    B, C, H, W = 256, 4, 16, 16
    hidden_layer_sizes = [128]
    latent_size = 32
    layer_sizes = [C * H * W, *hidden_layer_sizes, latent_size]

    x = jax.random.normal(k_x, (B, C, H, W), jnp.float32)
    params = init_encoder_params(k_p, layer_sizes)

    out = encoder_forward(x, params, latent_size)
    out = jax.block_until_ready(out)
    assert out.shape == (B, latent_size), out.shape

    # Tight check vs a bf16-matmul reference (same arithmetic as the kernel).
    ref_bf16 = _reference_forward(x, params, latent_size, bf16_matmul=True)
    assert jnp.allclose(out, ref_bf16, atol=2e-3, rtol=2e-3), \
        "mismatch vs bf16 reference"

    # Looser check vs the full-f32 (torch-semantics) reference.
    ref_f32 = _reference_forward(x, params, latent_size, bf16_matmul=False)
    assert jnp.allclose(out, ref_f32, atol=3e-2, rtol=3e-2), \
        "mismatch vs f32 reference"

    # Unbatched (C, H, W) path -> (latent,) output, exercises batch padding.
    out1 = encoder_forward(x[0], params, latent_size)
    out1 = jax.block_until_ready(out1)
    assert out1.shape == (latent_size,), out1.shape
    assert jnp.allclose(out1, out[0], atol=1e-5), "batched vs unbatched mismatch"

    print("KERNEL_OK")
</pallas_src>

<mosaic_0001>
module attributes {stable_mosaic.version = 11 : i64} {
  func.func @kernel(%arg0: i32, %arg1: memref<128x1024xbf16, #tpu.memory_space<vmem>>, %arg2: memref<1024x128xbf16, #tpu.memory_space<vmem>>, %arg3: memref<1x128xf32, #tpu.memory_space<vmem>>, %arg4: memref<128x128xbf16, #tpu.memory_space<vmem>>, %arg5: memref<1x128xf32, #tpu.memory_space<vmem>>, %arg6: memref<1x128xf32, #tpu.memory_space<vmem>>, %arg7: memref<1x128xf32, #tpu.memory_space<vmem>>, %arg8: memref<128x128xf32, #tpu.memory_space<vmem>>) attributes {dimension_semantics = [#tpu.dimension_semantics<parallel>], iteration_bounds = array<i64: 2>, scalar_prefetch = 0 : i64, scratch_operands = 0 : i64, tpu.core_type = #tpu.core_type<tc>, window_params = [{transform_indices = @transform_0, window_bounds = array<i64: 128, 1024>}, {pipeline_mode = #tpu.pipeline_mode<synchronous>, transform_indices = @transform_1, window_bounds = array<i64: 1024, 128>}, {pipeline_mode = #tpu.pipeline_mode<synchronous>, transform_indices = @transform_2, window_bounds = array<i64: 1, 128>}, {pipeline_mode = #tpu.pipeline_mode<synchronous>, transform_indices = @transform_3, window_bounds = array<i64: 128, 128>}, {pipeline_mode = #tpu.pipeline_mode<synchronous>, transform_indices = @transform_4, window_bounds = array<i64: 1, 128>}, {pipeline_mode = #tpu.pipeline_mode<synchronous>, transform_indices = @transform_5, window_bounds = array<i64: 1, 128>}, {pipeline_mode = #tpu.pipeline_mode<synchronous>, transform_indices = @transform_6, window_bounds = array<i64: 1, 128>}, {transform_indices = @transform_7, window_bounds = array<i64: 128, 128>}]} {
    %c0 = arith.constant 0 : index
    %c0_0 = arith.constant 0 : index
    %0 = vector.load %arg1[%c0, %c0_0] : memref<128x1024xbf16, #tpu.memory_space<vmem>>, vector<128x1024xbf16>
    %c0_1 = arith.constant 0 : index
    %c0_2 = arith.constant 0 : index
    %1 = vector.load %arg2[%c0_1, %c0_2] : memref<1024x128xbf16, #tpu.memory_space<vmem>>, vector<1024x128xbf16>
    %c0_3 = arith.constant 0 : index
    %c0_4 = arith.constant 0 : index
    %2 = vector.load %arg3[%c0_3, %c0_4] : memref<1x128xf32, #tpu.memory_space<vmem>>, vector<1x128xf32>
    %cst = arith.constant dense<0.000000e+00> : vector<128x128xf32>
    %3 = tpu.matmul %0, %1, %cst {dimension_numbers = #tpu.dot_dimension_numbers<[1], [0], [0], [1], [0, 0, 1, 1], [], []>} : vector<128x1024xbf16>, vector<1024x128xbf16>, vector<128x128xf32> -> vector<128x128xf32>
    %4 = vector.broadcast %2 : vector<1x128xf32> to vector<128x128xf32>
    %5 = arith.addf %3, %4 : vector<128x128xf32>
    %cst_5 = arith.constant 0.000000e+00 : f32
    %6 = vector.broadcast %cst_5 : f32 to vector<128x128xf32>
    %7 = arith.maximumf %5, %6 : vector<128x128xf32>
    %8 = arith.truncf %7 : vector<128x128xf32> to vector<128x128xbf16>
    %c0_6 = arith.constant 0 : index
    %c0_7 = arith.constant 0 : index
    %9 = vector.load %arg4[%c0_6, %c0_7] : memref<128x128xbf16, #tpu.memory_space<vmem>>, vector<128x128xbf16>
    %c0_8 = arith.constant 0 : index
    %c0_9 = arith.constant 0 : index
    %10 = vector.load %arg5[%c0_8, %c0_9] : memref<1x128xf32, #tpu.memory_space<vmem>>, vector<1x128xf32>
    %cst_10 = arith.constant dense<0.000000e+00> : vector<128x128xf32>
    %11 = tpu.matmul %8, %9, %cst_10 {dimension_numbers = #tpu.dot_dimension_numbers<[1], [0], [0], [1], [0, 0, 1, 1], [], []>} : vector<128x128xbf16>, vector<128x128xbf16>, vector<128x128xf32> -> vector<128x128xf32>
    %12 = vector.broadcast %10 : vector<1x128xf32> to vector<128x128xf32>
    %13 = arith.addf %11, %12 : vector<128x128xf32>
    %cst_11 = arith.constant dense<0.000000e+00> : vector<128xf32>
    %14 = vector.multi_reduction <add>, %13, %cst_11 [1] : vector<128x128xf32> to vector<128xf32>
    %15 = vector.shape_cast %14 : vector<128xf32> to vector<128x1xf32>
    %cst_12 = arith.constant 3.125000e-02 : f32
    %16 = vector.broadcast %cst_12 : f32 to vector<128x1xf32>
    %17 = arith.mulf %15, %16 : vector<128x1xf32>
    %18 = vector.broadcast %17 : vector<128x1xf32> to vector<128x128xf32>
    %19 = arith.subf %13, %18 : vector<128x128xf32>
    %20 = tpu.iota {dimensions = array<i32: 1>} : vector<128x128xi32>
    %c32_i32 = arith.constant 32 : i32
    %21 = vector.broadcast %c32_i32 : i32 to vector<128x128xi32>
    %22 = arith.cmpi slt, %20, %21 : vector<128x128xi32>
    %cst_13 = arith.constant 0.000000e+00 : f32
    %23 = vector.broadcast %cst_13 : f32 to vector<128x128xf32>
    %24 = arith.select %22, %19, %23 : vector<128x128xi1>, vector<128x128xf32>
    %25 = arith.mulf %24, %24 : vector<128x128xf32>
    %cst_14 = arith.constant dense<0.000000e+00> : vector<128xf32>
    %26 = vector.multi_reduction <add>, %25, %cst_14 [1] : vector<128x128xf32> to vector<128xf32>
    %27 = vector.shape_cast %26 : vector<128xf32> to vector<128x1xf32>
    %cst_15 = arith.constant 3.125000e-02 : f32
    %28 = vector.broadcast %cst_15 : f32 to vector<128x1xf32>
    %29 = arith.mulf %27, %28 : vector<128x1xf32>
    %cst_16 = arith.constant 9.99999974E-6 : f32
    %30 = vector.broadcast %cst_16 : f32 to vector<128x1xf32>
    %31 = arith.addf %29, %30 : vector<128x1xf32>
    %32 = math.rsqrt %31 : vector<128x1xf32>
    %33 = vector.broadcast %32 : vector<128x1xf32> to vector<128x128xf32>
    %34 = arith.mulf %19, %33 : vector<128x128xf32>
    %c0_17 = arith.constant 0 : index
    %c0_18 = arith.constant 0 : index
    %35 = vector.load %arg6[%c0_17, %c0_18] : memref<1x128xf32, #tpu.memory_space<vmem>>, vector<1x128xf32>
    %36 = vector.broadcast %35 : vector<1x128xf32> to vector<128x128xf32>
    %37 = arith.mulf %34, %36 : vector<128x128xf32>
    %c0_19 = arith.constant 0 : index
    %c0_20 = arith.constant 0 : index
    %38 = vector.load %arg7[%c0_19, %c0_20] : memref<1x128xf32, #tpu.memory_space<vmem>>, vector<1x128xf32>
    %39 = vector.broadcast %38 : vector<1x128xf32> to vector<128x128xf32>
    %40 = arith.addf %37, %39 : vector<128x128xf32>
    %41 = math.tanh %40 : vector<128x128xf32>
    %c0_21 = arith.constant 0 : index
    %c0_22 = arith.constant 0 : index
    %42 = vector.load %arg8[%c0_21, %c0_22] : memref<128x128xf32, #tpu.memory_space<vmem>>, vector<128x128xf32>
    tpu.vector_store %arg8[%c0_21, %c0_22], %41 {strides = array<i32>} : memref<128x128xf32, #tpu.memory_space<vmem>>, vector<128x128xf32>,
    return
  }
  func.func @transform_0(%arg0: i32) -> (i32, i32) {
    %c0_i32 = arith.constant 0 : i32
    %c0_i32_0 = arith.constant 0 : i32
    return %arg0, %c0_i32 : i32, i32
  }
  func.func @transform_1(%arg0: i32) -> (i32, i32) {
    %c0_i32 = arith.constant 0 : i32
    %c0_i32_0 = arith.constant 0 : i32
    %c0_i32_1 = arith.constant 0 : i32
    return %c0_i32, %c0_i32_0 : i32, i32
  }
  func.func @transform_2(%arg0: i32) -> (i32, i32) {
    %c0_i32 = arith.constant 0 : i32
    %c0_i32_0 = arith.constant 0 : i32
    %c0_i32_1 = arith.constant 0 : i32
    return %c0_i32, %c0_i32_0 : i32, i32
  }
  func.func @transform_3(%arg0: i32) -> (i32, i32) {
    %c0_i32 = arith.constant 0 : i32
    %c0_i32_0 = arith.constant 0 : i32
    %c0_i32_1 = arith.constant 0 : i32
    return %c0_i32, %c0_i32_0 : i32, i32
  }
  func.func @transform_4(%arg0: i32) -> (i32, i32) {
    %c0_i32 = arith.constant 0 : i32
    %c0_i32_0 = arith.constant 0 : i32
    %c0_i32_1 = arith.constant 0 : i32
    return %c0_i32, %c0_i32_0 : i32, i32
  }
  func.func @transform_5(%arg0: i32) -> (i32, i32) {
    %c0_i32 = arith.constant 0 : i32
    %c0_i32_0 = arith.constant 0 : i32
    %c0_i32_1 = arith.constant 0 : i32
    return %c0_i32, %c0_i32_0 : i32, i32
  }
  func.func @transform_6(%arg0: i32) -> (i32, i32) {
    %c0_i32 = arith.constant 0 : i32
    %c0_i32_0 = arith.constant 0 : i32
    %c0_i32_1 = arith.constant 0 : i32
    return %c0_i32, %c0_i32_0 : i32, i32
  }
  func.func @transform_7(%arg0: i32) -> (i32, i32) {
    %c0_i32 = arith.constant 0 : i32
    %c0_i32_0 = arith.constant 0 : i32
    return %arg0, %c0_i32 : i32, i32
  }
}

</mosaic_0001>

<bundles_post_ra>
// kernel: tpu_custom_call.1
= control target key start
LH: loop header
LB: loop body
LE: loop exit
PB: predicated region body
PF: predicated region fallthrough
CT: control target
= control target key end

     0   :  { %12 = vsyncpa [#allocation3], 0  ;;  %s3672_s0 = inlined_call_operand.hbm [shape: bf16[256,1024], index: 0, kind: input, shape index: {}]   ;;  %s3673_s1 = inlined_call_operand.hbm [shape: bf16[1024,128], index: 1, kind: input, shape index: {}]   ;;  %s3674_s2 = inlined_call_operand.vmem [shape: f32[1,128], index: 2, kind: input, shape index: {}]   ;;  %s3675_s3 = inlined_call_operand.hbm [shape: bf16[128,128], index: 3, kind: input, shape index: {}]   ;;  %s3676_s4 = inlined_call_operand.vmem [shape: f32[1,128], index: 4, kind: input, shape index: {}]   ;;  %s3677_s5 = inlined_call_operand.vmem [shape: f32[1,128], index: 5, kind: input, shape index: {}]   ;;  %s3678_s6 = inlined_call_operand.vmem [shape: f32[1,128], index: 6, kind: input, shape index: {}]   ;;  %s3679_s7 = inlined_call_operand.hbm [shape: f32[256,128], index: 7, kind: output, shape index: {}]  }
   0x1   :  { %14 = vsyncpa [#allocation3 + $0x1], 0 }
   0x2   :  { %15 = vsyncpa [#allocation6], 0 }
   0x3   :  { %16 = vsyncpa [#allocation4], 0 }
   0x4   :  { %18 = vsyncpa [#allocation4 + $0x1], 0  ;;  %s3091_s24 = smov 0   ;;  %s3093_s25 = smov 0  }
   0x5   :  { %s3095_s26 = smov 0   ;;  %s3097_s27 = smov 0  }
   0x6 LB: > { %s3112_s28 = sadd.s32 4294967295, %s3039_s27   ;;  %s2192_s29 = sadd.s32 4294967294, %s3039_s27   ;;  %s3039_s27 = sphi %s3097_s27, %s3699_s27   ;;  %s3035_s26 = sphi %s3095_s26, %s3698_s26   ;;  %s3031_s25 = sphi %s3093_s25, %s3697_s25   ;;  %s3027_s24 = sphi %s3091_s24, %s3696_s24  }
   0x7   : > { %p44_p0 = scmp.ne.s32.totalorder %s3031_s25, %s3027_s24  ;;  %p3680_p1 = scmp.eq.s32.totalorder %s3112_s28, 0 }
   0x8   : > { %p200_p3 = scmp.eq.s32.totalorder %s2192_s29, 1  ;;  %p2193_p5 = scmp.ge.s32.totalorder %s3039_s27, 1 }
   0x9   : > { %p3121_p4 = por %p3680_p1, %p44_p0  ;;  %p207_p7 = scmp.lt.s32.totalorder %s3039_s27, 3 }
   0xa   : > { %p3126_p6 = por %p200_p3, %p44_p0  ;;  %s3041_s10 = smov [#allocation5]  }
   0xb   : > { %s3683_s30 = scalar_select %p3121_p4, 1, 0 }
   0xc   : > { %s3684_s8 = scalar_select %p3126_p6, 1, 0 }
   0xd   : > { %p3131_p8 = pnand %p2193_p5, %p207_p7  ;;  %s219_s11 = sshll.u32 %s3041_s10, 4  ;;  %s3135_s11 = int_to_ptr.vmem [resolvable:$true] %s219_s11 }
   0xe   : > { %s3042_s13 = smov [#allocation7]   ;;  %s2883_s17 = scalar_lea.hbm %s3673_s1, 8192 }
   0xf   : > { %p2686_p9 = pneg %p3131_p8  ;;  %s235_s14 = sshll.u32 %s3042_s13, 4  ;;  %s3146_s14 = int_to_ptr.vmem [resolvable:$true] %s235_s14 }
  0x10   : > { %p2884_p12 = scmp.ne.s32.totalorder %s3673_s1, %s2883_s17  ;;  %p2890_p5 = scmp.lt.u32.totalorder %s2883_s17, %s3673_s1 }
  0x11   : > { %p3142_p11 = pnand %p2686_p9, %p3680_p1 }
  0x13   : > { %p2885_p13 = pneg %p3142_p11 }
  0x15   : > { %p2886_p0 = pnand %p2885_p13, %p2884_p12 }
  0x17   : > { %p2887_p3 = pneg %p2886_p0 }
  0x19   : > { %p2892_p7 = pnand %p2890_p5, %p2887_p3 }
  0x1b   : > { %2895 = shalt.err (!%p2892_p7)
}
  0x1c   : > { %s2896_s22 = scalar_lea.vmem %s3135_s11, 8192  ;;  %p2904_p2 = scmp.lt.s32.totalorder %s3135_s11, %s3135_s11 }
  0x1d   : > { %p2897_p9 = scmp.ne.s32.totalorder %s3135_s11, %s2896_s22  ;;  %p2905_p12 = scmp.lt.s32.totalorder %s2896_s22, %s2896_s22 }
  0x1f   : > { %p2899_p10 = pnand %p2897_p9, %p2885_p13  ;;  %p2906_p0 = por %p2905_p12, %p2904_p2 }
  0x21   : > { %p2900_p1 = pneg %p2899_p10 }
  0x23   : > { %p2907_p6 = pnand %p2906_p0, %p2900_p1 }
  0x25   : > { %2910 = shalt.err (!%p2907_p6)
}
  0x26   : > { %s3043_s23 = smov 64   ;;  %s3044_s29 = smov 4  }
  0x27   : > { %2689 = dma.hbm_to_vmem [thread:$0]  (!%p3142_p11), %s3673_s1, 8192, %s3135_s11, [#allocation6], %s3043_s23, %s3043_s23, %s3044_s29  }
  0x28   : > { %s2911_s17 = scalar_lea.hbm %s3675_s3, 1024 }
  0x29   : > { %p2912_p2 = scmp.ne.s32.totalorder %s3675_s3, %s2911_s17  ;;  %p2918_p10 = scmp.lt.u32.totalorder %s2911_s17, %s3675_s3 }
  0x2b   : > { %p2914_p1 = pnand %p2912_p2, %p2885_p13 }
  0x2d   : > { %p2915_p6 = pneg %p2914_p1 }
  0x2f   : > { %p2920_p3 = pnand %p2918_p10, %p2915_p6 }
  0x31   : > { %2923 = shalt.err (!%p2920_p3)
}
  0x32   : > { %s2924_s11 = scalar_lea.vmem %s3146_s14, 1024  ;;  %p2932_p12 = scmp.lt.s32.totalorder %s3146_s14, %s3146_s14 }
  0x33   : > { %p2925_p5 = scmp.ne.s32.totalorder %s3146_s14, %s2924_s11  ;;  %p2933_p0 = scmp.lt.s32.totalorder %s2924_s11, %s2924_s11 }
  0x35   : > { %p2927_p7 = pnand %p2925_p5, %p2885_p13  ;;  %p2934_p2 = por %p2933_p0, %p2932_p12 }
  0x37   : > { %p2928_p9 = pneg %p2927_p7 }
  0x39   : > { %p2935_p1 = pnand %p2934_p2, %p2928_p9 }
  0x3b   : > { %2938 = shalt.err (!%p2935_p1)
}
  0x3c   : > { %2692 = dma.hbm_to_vmem [thread:$0]  (!%p3142_p11), %s3675_s3, 1024, %s3146_s14, [#allocation6], %s3043_s23, %s3043_s23, %s3044_s29  }
  0x3d   : > { %s3201_s13 = sadd.s32 1, %s3039_s27   ;;  %s31_s12 = sadd.s32 1, %s3035_s26 }
  0x3e   : > { %s28_s15 = ssub.s32 %s3039_s27, %s3201_s13  ;;  %p38_p13 = scmp.ne.s32.totalorder %s3035_s26, %s3031_s25 }
  0x3f   : > { %p29_p6 = scmp.eq.s32.totalorder %s28_s15, 0  ;;  %p39_p10 = scmp.eq.s32.totalorder %s3039_s27, 0 }
  0x40   : > { %p3687_p3 = scmp.eq.s32.totalorder %s3112_s28, 1  ;;  %p2703_p7 = scmp.lt.s32.totalorder %s3039_s27, 2 }
  0x41   : > { %s3217_s17 = scalar_select %p29_p6, %s3035_s26, %s31_s12  }
  0x42   : > { %p3211_p5 = por %p3687_p3, %p38_p13  ;;  %p40_p9 = por %p39_p10, %p38_p13 }
  0x43   : > { %s258_s18 = sand.u32 1, %s3035_s26   ;;  %s2352_s14 = sshll.u32 %s3039_s27, 13 }
  0x44   : > { %s3688_s16 = scalar_select %p3211_p5, 1, 0 }
  0x45   : > { %s2197_s19 = sshll.u32 %s258_s18, 9  ;;  %s3224_s20 = scalar_lea.hbm %s3672_s0, %s2352_s14 }
  0x46   : > { %s262_s21 = scalar_lea.vmem [#allocation2], %s2197_s19  ;;  %p3228_p11 = pnand %p2703_p7, %p40_p9 }
  0x47   : > { %s270_s11 = sshll.u32 %s262_s21, 4  ;;  %s3232_s10 = scalar_lea.sflag [#allocation3], %s258_s18  ;;  %s3226_s11 = int_to_ptr.vmem [resolvable:$true] %s270_s11 }
  0x48   : > { %s2939_s12 = scalar_lea.hbm %s3224_s20, 8192  ;;  %p2941_p0 = pneg %p3228_p11 }
  0x49   : > { %p2940_p12 = scmp.ne.s32.totalorder %s3224_s20, %s2939_s12  ;;  %s2944_s14 = scalar_lea.hbm %s3672_s0, 16384 }
  0x4a   : > { %p2945_p13 = scmp.lt.u32.totalorder %s3224_s20, %s3672_s0  ;;  %p2946_p6 = scmp.lt.u32.totalorder %s2944_s14, %s2939_s12 }
  0x4b   : > { %p2942_p2 = pnand %p2941_p0, %p2940_p12  ;;  %p2948_p3 = scmp.lt.u32.totalorder %s2939_s12, %s3224_s20 }
  0x4c   : > { %p2947_p10 = por %p2946_p6, %p2945_p13 }
  0x4d   : > { %p2943_p1 = pneg %p2942_p2 }
  0x4e   : > { %p2949_p7 = por %p2948_p3, %p2947_p10 }
  0x50   : > { %p2950_p9 = pnand %p2949_p7, %p2943_p1 }
  0x52   : > { %2953 = shalt.err (!%p2950_p9)
}
  0x53   : > { %s2954_s18 = scalar_lea.vmem %s3226_s11, 8192  ;;  %s3045_s21 = smov [#allocation2]  }
  0x54   : > { %p2955_p12 = scmp.ne.s32.totalorder %s3226_s11, %s2954_s18  ;;  %s2959_s15 = sshll.u32 %s3045_s21, 4  ;;  %s2960_s15 = int_to_ptr.vmem [resolvable:$false] %s2959_s15 }
  0x55   : > { %s2961_s19 = scalar_lea.vmem %s2960_s15, 16384  ;;  %p2962_p4 = scmp.lt.s32.totalorder %s3226_s11, %s2960_s15 }
  0x56   : > { %p2957_p2 = pnand %p2955_p12, %p2941_p0  ;;  %p2963_p13 = scmp.lt.s32.totalorder %s2961_s19, %s2954_s18 }
  0x58   : > { %p2958_p5 = pneg %p2957_p2  ;;  %p2964_p6 = por %p2963_p13, %p2962_p4 }
  0x5a   : > { %p2965_p10 = pnand %p2964_p6, %p2958_p5 }
  0x5c   : > { %2968 = shalt.err (!%p2965_p10)
}
  0x5d   : > { %s3046_s12 = smov 512   ;;  %s3047_s14 = smov 32  }
  0x5e   : > { %2696 = dma.hbm_to_vmem [thread:$0]  (!%p3228_p11), %s3224_s20, 8192, %s3226_s11, %s3232_s10, %s3046_s12, %s3046_s12, %s3047_s14  }
  0x5f   : > { %282 = sbr.rel (%p3131_p8) target bundleno = 1045 (0x415), region = 48  ;;  %s3263_s23 = sand.u32 (!%p3131_p8), 1, %s3031_s25  }
  0x60   : > { %s2202_s29 = sshll.u32 (!%p3131_p8), %s3263_s23, 9  ;;  %s285_s18 = scalar_lea.sflag (!%p3131_p8), [#allocation3], %s3263_s23 }
  0x61   : > { %s3267_s21 = scalar_lea.vmem (!%p3131_p8), [#allocation2], %s2202_s29  ;;  %p3690_p4 = scmp.ne.s32.totalorder (!%p3131_p8), %s3683_s30, 0 }
  0x66   : > { %3014 = dma.done.wait (%p3690_p4), %s285_s18, 8192  }
  0x67   : > { %3016 = vsyncadd (%p3690_p4), %s285_s18, 4294959104  ;;  %p3691_p5 = scmp.eq.s32.totalorder %s3112_s28, 0 }
  0x69   : > { %3018 = dma.done.wait (%p3691_p5), [#allocation6], 9216   ;;  %p3692_p8 = pmov %p3691_p5 }
  0x6a   : > { %v2747_v0 = vld [vmem:[#allocation5 + $0x40] sm:$0xff]   ;;  %v2751_v4 = vld [vmem:[#allocation5 + $0x48] sm:$0xff]   ;;  %v2755_v8 = vld [vmem:[#allocation5 + $0x50] sm:$0xff]   ;;  %s2205_s12 = sshll.u32 %s3263_s23, 7  ;;  %s2353_s29 = sshll.u32 %s3112_s28, 11 }
  0x6b   : > { %3020 = vsyncadd (%p3692_p8), [#allocation6], 4294958080  ;;  %v2748_v1 = vld [vmem:[#allocation5 + $0xc0] sm:$0xff]   ;;  %2354 = vmatprep.subr.bf16.mxu0 %v2747_v0  ;;  %v2752_v5 = vld [vmem:[#allocation5 + $0xc8] sm:$0xff]   ;;  %s3568_s14 = scalar_lea.vmem [#allocation8], %s2205_s12  ;;  %s3624_s9 = scalar_lea.hbm %s3679_s7, %s2353_s29 }
  0x6c   : > { %v2749_v2 = vld [vmem:[#allocation5] sm:$0xff]   ;;  %2418 = vmatprep.subr.bf16.mxu1 %v2748_v1  ;;  %v2753_v6 = vld [vmem:[#allocation5 + $0x8] sm:$0xff]   ;;  %v2756_v9 = vld [vmem:[#allocation5 + $0xd0] sm:$0xff]   ;;  %s2100_s18 = sshll.u32 %s3568_s14, 4  ;;  %s2087_s20 = scalar_lea.sflag [#allocation4], %s3263_s23  ;;  %s3626_s18 = int_to_ptr.vmem [resolvable:$true] %s2100_s18 }
  0x6d   : > { %v2750_v3 = vld [vmem:[#allocation5 + $0x80] sm:$0xff]   ;;  %2355 = vmatpush3.bf16.msra.mxu0 %v2749_v2  ;;  %v2754_v7 = vld [vmem:[#allocation5 + $0x88] sm:$0xff]   ;;  %v2757_v10 = vld [vmem:[#allocation5 + $0x10] sm:$0xff]   ;;  %s2969_s11 = scalar_lea.vmem %s3626_s18, 2048  ;;  %p3693_p0 = scmp.ne.s32.totalorder %s3688_s16, 0 }
  0x6e   : > { %2419 = vmatpush3.bf16.msra.mxu1 %v2750_v3  ;;  %2356 = vmatprep.subr.bf16.mxu0 %v2751_v4  ;;  %v2758_v11 = vld [vmem:[#allocation5 + $0x90] sm:$0xff]   ;;  %v2759_v12 = vld [vmem:[#allocation5 + $0x58] sm:$0xff]   ;;  %v2763_v16 = vld [vmem:[#allocation5 + $0x60] sm:$0xff]   ;;  %p2970_p11 = scmp.ne.s32.totalorder %s3626_s18, %s2969_s11  ;;  %s3048_s28 = smov [#allocation8]  }
  0x6f   : > { %2420 = vmatprep.subr.bf16.mxu1 %v2752_v5  ;;  %v2760_v13 = vld [vmem:[#allocation5 + $0xd8] sm:$0xff]   ;;  %v2764_v17 = vld [vmem:[#allocation5 + $0xe0] sm:$0xff]   ;;  %v2767_v20 = vld [vmem:[#allocation5 + $0x68] sm:$0xff]   ;;  %s2973_s22 = sshll.u32 %s3048_s28, 4  ;;  %s2974_s22 = int_to_ptr.vmem [resolvable:$false] %s2973_s22 }
  0x70   : > { %v2761_v14 = vld [vmem:[#allocation5 + $0x18] sm:$0xff]   ;;  %v2765_v18 = vld [vmem:[#allocation5 + $0x20] sm:$0xff]   ;;  %v2768_v21 = vld [vmem:[#allocation5 + $0xe8] sm:$0xff]   ;;  %p2971_p1 = pnand %p2970_p11, %p3693_p0  ;;  %s2975_s10 = scalar_lea.vmem %s2974_s22, 4096 }
  0x71   : > { %2357 = vmatpush3.bf16.msra.mxu0 %v2753_v6  ;;  %v2762_v15 = vld [vmem:[#allocation5 + $0x98] sm:$0xff]   ;;  %v2766_v19 = vld [vmem:[#allocation5 + $0xa0] sm:$0xff]   ;;  %v2769_v22 = vld [vmem:[#allocation5 + $0x28] sm:$0xff]   ;;  %p2976_p7 = scmp.lt.s32.totalorder %s3626_s18, %s2974_s22  ;;  %p2977_p9 = scmp.lt.s32.totalorder %s2975_s10, %s2969_s11 }
  0x72   : > { %2421 = vmatpush3.bf16.msra.mxu1 %v2754_v7  ;;  %2358 = vmatprep.subr.bf16.mxu0 %v2755_v8  ;;  %v2770_v23 = vld [vmem:[#allocation5 + $0xa8] sm:$0xff]   ;;  %v2771_v24 = vld [vmem:[#allocation5 + $0x70] sm:$0xff]   ;;  %v2775_v28 = vld [vmem:[#allocation5 + $0x78] sm:$0xff]   ;;  %p2972_p3 = pneg %p2971_p1 }
  0x73   : > { %2422 = vmatprep.subr.bf16.mxu1 %v2756_v9  ;;  %v2772_v25 = vld [vmem:[#allocation5 + $0xf0] sm:$0xff]   ;;  %v2776_v29 = vld [vmem:[#allocation5 + $0xf8] sm:$0xff]   ;;  %v330_v32 = vld [vmem:[%s3267_s21] sm:$0xff]  ;;  %p2978_p12 = por %p2977_p9, %p2976_p7 }
  0x74   : > { %v2773_v26 = vld [vmem:[#allocation5 + $0x30] sm:$0xff]   ;;  %v2777_v30 = vld [vmem:[#allocation5 + $0x38] sm:$0xff]   ;;  %v334_v33 = vld [vmem:[%s3267_s21 + $0x20] sm:$0xff] }
  0x75   : > { %2359 = vmatpush3.bf16.msra.mxu0 %v2757_v10  ;;  %v2774_v27 = vld [vmem:[#allocation5 + $0xb0] sm:$0xff]   ;;  %v2778_v31 = vld [vmem:[#allocation5 + $0xb8] sm:$0xff]   ;;  %v331_v34 = vld [vmem:[%s3267_s21 + $0x8] sm:$0xff]  ;;  %v2207_v35 = vcombine.low %v330_v32, %v334_v33  ;;  %v2208_v36 = vcombine.high %v330_v32, %v334_v33  ;;  %p2979_p2 = pnand %p2978_p12, %p2972_p3 }
  0x76   : > { %2423 = vmatpush3.bf16.msra.mxu1 %v2758_v11  ;;  %2360 = vmatprep.subr.bf16.mxu0 %v2759_v12  ;;  %v335_v37 = vld [vmem:[%s3267_s21 + $0x28] sm:$0xff]  ;;  %v2779_v40 = vld [vmem:[#allocation5 + $0x140] sm:$0xff]   ;;  %v2787_v62 = vld [vmem:[#allocation5 + $0x150] sm:$0xff]  }
  0x77   : > { %2424 = vmatprep.subr.bf16.mxu1 %v2760_v13  ;;  %v2209_v38 = vcombine.low %v331_v34, %v335_v37  ;;  %v2210_v39 = vcombine.high %v331_v34, %v335_v37  ;;  %1265 = vmatprep.mubr.bf16.mxu0 %v2208_v36  ;;  %v2780_v41 = vld [vmem:[#allocation5 + $0x100] sm:$0xff]   ;;  %v339_v47 = vld [vmem:[%s3267_s21 + $0x48] sm:$0xff]  ;;  %v2788_v63 = vld [vmem:[#allocation5 + $0x110] sm:$0xff]  }
  0x78   : > { %v2781_v42 = vld [vmem:[#allocation5 + $0x1c0] sm:$0xff]   ;;  %v343_v48 = vld [vmem:[%s3267_s21 + $0x68] sm:$0xff]  ;;  %v2789_v0 = vld [vmem:[#allocation5 + $0x1d0] sm:$0xff]  }
  0x79   : > { %2361 = vmatpush3.bf16.msra.mxu0 %v2761_v14  ;;  %1362 = vmatprep.mubr.bf16.mxu1 %v2210_v39  ;;  %v2782_v43 = vld [vmem:[#allocation5 + $0x180] sm:$0xff]   ;;  %v2218_v49 = vcombine.high %v339_v47, %v343_v48  ;;  %v2783_v50 = vld [vmem:[#allocation5 + $0x148] sm:$0xff]   ;;  %v2217_v53 = vcombine.low %v339_v47, %v343_v48  ;;  %v2790_v1 = vld [vmem:[#allocation5 + $0x190] sm:$0xff]  }
  0x7a   : > { %2425 = vmatpush3.bf16.msra.mxu1 %v2762_v15  ;;  %2362 = vmatprep.subr.bf16.mxu0 %v2763_v16  ;;  %v338_v44 = vld [vmem:[%s3267_s21 + $0x40] sm:$0xff]  ;;  %v2784_v52 = vld [vmem:[#allocation5 + $0x108] sm:$0xff]   ;;  %v2791_v10 = vld [vmem:[#allocation5 + $0x158] sm:$0xff]  }
  0x7b   : > { %2426 = vmatprep.subr.bf16.mxu1 %v2764_v17  ;;  %v342_v45 = vld [vmem:[%s3267_s21 + $0x60] sm:$0xff]  ;;  %v2785_v54 = vld [vmem:[#allocation5 + $0x1c8] sm:$0xff]   ;;  %v2792_v11 = vld [vmem:[#allocation5 + $0x118] sm:$0xff]  }
  0x7c   : > { %v2216_v46 = vcombine.high %v338_v44, %v342_v45  ;;  %v2215_v51 = vcombine.low %v338_v44, %v342_v45  ;;  %v2786_v55 = vld [vmem:[#allocation5 + $0x188] sm:$0xff]   ;;  %v346_v56 = vld [vmem:[%s3267_s21 + $0x80] sm:$0xff]  ;;  %v2793_v12 = vld [vmem:[#allocation5 + $0x1d8] sm:$0xff]  }
  0x7d   : > { %2363 = vmatpush3.bf16.msra.mxu0 %v2765_v18  ;;  %v350_v57 = vld [vmem:[%s3267_s21 + $0xa0] sm:$0xff]  ;;  %v347_v58 = vld [vmem:[%s3267_s21 + $0x88] sm:$0xff]  ;;  %v2794_v13 = vld [vmem:[#allocation5 + $0x198] sm:$0xff]  }
  0x7e   : > { %2427 = vmatpush3.bf16.msra.mxu1 %v2766_v19  ;;  %2364 = vmatprep.subr.bf16.mxu0 %v2767_v20  ;;  %v351_v59 = vld [vmem:[%s3267_s21 + $0xa8] sm:$0xff]  ;;  %v2224_v60 = vcombine.high %v346_v56, %v350_v57  ;;  %v2223_v2 = vcombine.low %v346_v56, %v350_v57  ;;  %v354_v3 = vld [vmem:[%s3267_s21 + $0xc0] sm:$0xff]  ;;  %v2804_v39 = vld [vmem:[#allocation5 + $0x130] sm:$0xff]  }
  0x7f   : > { %2428 = vmatprep.subr.bf16.mxu1 %v2768_v21  ;;  %v2226_v61 = vcombine.high %v347_v58, %v351_v59  ;;  %v358_v4 = vld [vmem:[%s3267_s21 + $0xe0] sm:$0xff]  ;;  %v355_v5 = vld [vmem:[%s3267_s21 + $0xc8] sm:$0xff]  ;;  %v2225_v6 = vcombine.low %v347_v58, %v351_v59  ;;  %v2808_v48 = vld [vmem:[#allocation5 + $0x138] sm:$0xff]  }
  0x80   : > { %v2232_v7 = vcombine.high %v354_v3, %v358_v4  ;;  %v359_v8 = vld [vmem:[%s3267_s21 + $0xe8] sm:$0xff]  ;;  %v362_v14 = vld [vmem:[%s3267_s21 + $0x100] sm:$0xff]  ;;  %v2231_v19 = vcombine.low %v354_v3, %v358_v4 }
  0x81   : > { %2365 = vmatpush3.bf16.msra.mxu0 %v2769_v22  ;;  %v2234_v9 = vcombine.high %v355_v5, %v359_v8  ;;  %v366_v15 = vld [vmem:[%s3267_s21 + $0x120] sm:$0xff]  ;;  %v363_v16 = vld [vmem:[%s3267_s21 + $0x108] sm:$0xff]  ;;  %v2233_v21 = vcombine.low %v355_v5, %v359_v8  ;;  %v341_v8 = vld [vmem:[%s3267_s21 + $0x58] sm:$0xff] }
  0x82   : > { %2429 = vmatpush3.bf16.msra.mxu1 %v2770_v23  ;;  %2366 = vmatprep.subr.bf16.mxu0 %v2771_v24  ;;  %v367_v17 = vld [vmem:[%s3267_s21 + $0x128] sm:$0xff]  ;;  %v2795_v18 = vld [vmem:[#allocation5 + $0x160] sm:$0xff]   ;;  %v2240_v22 = vcombine.high %v362_v14, %v366_v15  ;;  %v2239_v34 = vcombine.low %v362_v14, %v366_v15  ;;  %v348_v14 = vld [vmem:[%s3267_s21 + $0x90] sm:$0xff] }
  0x83   : > { %2430 = vmatprep.subr.bf16.mxu1 %v2772_v25  ;;  %v2796_v20 = vld [vmem:[#allocation5 + $0x120] sm:$0xff]   ;;  %v2242_v24 = vcombine.high %v363_v16, %v367_v17  ;;  %v2801_v32 = vld [vmem:[#allocation5 + $0x1e8] sm:$0xff]   ;;  %v352_v15 = vld [vmem:[%s3267_s21 + $0xb0] sm:$0xff] }
  0x84   : > { %v2797_v23 = vld [vmem:[#allocation5 + $0x1e0] sm:$0xff]   ;;  %v2802_v33 = vld [vmem:[#allocation5 + $0x1a8] sm:$0xff]  }
  0x85   : > { %2367 = vmatpush3.bf16.msra.mxu0 %v2773_v26  ;;  %v2798_v25 = vld [vmem:[#allocation5 + $0x1a0] sm:$0xff]   ;;  %v379_v44 = vld [vmem:[%s3267_s21 + $0x188] sm:$0xff] }
  0x86   : > { %2431 = vmatpush3.bf16.msra.mxu1 %v2774_v27  ;;  %2368 = vmatprep.subr.bf16.mxu0 %v2775_v28  ;;  %v370_v26 = vld [vmem:[%s3267_s21 + $0x140] sm:$0xff]  ;;  %v2799_v28 = vld [vmem:[#allocation5 + $0x168] sm:$0xff]  }
  0x87   : > { %2432 = vmatprep.subr.bf16.mxu1 %v2776_v29  ;;  %v374_v27 = vld [vmem:[%s3267_s21 + $0x160] sm:$0xff]  ;;  %v371_v29 = vld [vmem:[%s3267_s21 + $0x148] sm:$0xff] }
  0x88   : > { %v2248_v36 = vcombine.high %v370_v26, %v374_v27  ;;  %v383_v45 = vld [vmem:[%s3267_s21 + $0x1a8] sm:$0xff]  ;;  %v2247_v47 = vcombine.low %v370_v26, %v374_v27  ;;  %v2227_v26 = vcombine.low %v348_v14, %v352_v15 }
  0x89   : > { %2369 = vmatpush3.bf16.msra.mxu0 %v2777_v30  ;;  %v375_v30 = vld [vmem:[%s3267_s21 + $0x168] sm:$0xff]  ;;  %v2257_v59 = vcombine.low %v379_v44, %v383_v45 }
  0x8a   : > { %2433 = vmatpush3.bf16.msra.mxu1 %v2778_v31  ;;  %2482 = vmatprep.subr.bf16.mxu0 %v2779_v40  ;;  %v2800_v31 = vld [vmem:[#allocation5 + $0x128] sm:$0xff]   ;;  %v2250_v37 = vcombine.high %v371_v29, %v375_v30  ;;  %v2805_v40 = vld [vmem:[#allocation5 + $0x1f0] sm:$0xff]  }
  0x8b   : > { %2546 = vmatprep.subr.bf16.mxu1 %v2781_v42  ;;  %v382_v42 = vld [vmem:[%s3267_s21 + $0x1a0] sm:$0xff]  ;;  %v387_v56 = vld [vmem:[%s3267_s21 + $0x1c8] sm:$0xff] }
  0x8c   : > { %1266 = vmatmul.mubr.bf16.vlgmr.msra.gmra.mrb[0].mxu0 %v2207_v35  ;;  %v2241_v35 = vcombine.low %v363_v16, %v367_v17  ;;  %v391_v57 = vld [vmem:[%s3267_s21 + $0x1e8] sm:$0xff]  ;;  %v349_v16 = vld [vmem:[%s3267_s21 + $0x98] sm:$0xff] }
  0x8d   : > { %1363 = vmatmul.mubr.bf16.vlgmr.msra.gmra.mrb[0].mxu1 %v2209_v38  ;;  %2483 = vmatpush3.bf16.msra.mxu0 %v2780_v41  ;;  %v2803_v38 = vld [vmem:[#allocation5 + $0x170] sm:$0xff]   ;;  %v378_v41 = vld [vmem:[%s3267_s21 + $0x180] sm:$0xff]  ;;  %v2265_v3 = vcombine.low %v387_v56, %v391_v57  ;;  %v353_v17 = vld [vmem:[%s3267_s21 + $0xb8] sm:$0xff] }
  0x8e   : > { %2547 = vmatpush3.bf16.msra.mxu1 %v2782_v43  ;;  %1273 = vmatprep.mubr.bf16.mxu0 %v2216_v46  ;;  %v2806_v43 = vld [vmem:[#allocation5 + $0x1b0] sm:$0xff]   ;;  %v2807_v46 = vld [vmem:[#allocation5 + $0x178] sm:$0xff]   ;;  %v2255_v58 = vcombine.low %v378_v41, %v382_v42  ;;  %v2229_v27 = vcombine.low %v349_v16, %v353_v17 }
  0x8f   : > { %1370 = vmatprep.mubr.bf16.mxu1 %v2218_v49  ;;  %2484 = vmatprep.subr.bf16.mxu0 %v2783_v50  ;;  %v2249_v49 = vcombine.low %v371_v29, %v375_v30  ;;  %v2256_v50 = vcombine.high %v378_v41, %v382_v42  ;;  %v364_v30 = vld [vmem:[%s3267_s21 + $0x110] sm:$0xff]  ;;  %v377_v41 = vld [vmem:[%s3267_s21 + $0x178] sm:$0xff] }
  0x90   : > { %2548 = vmatprep.subr.bf16.mxu1 %v2785_v54  ;;  %v386_v54 = vld [vmem:[%s3267_s21 + $0x1c0] sm:$0xff] }
  0x91   : > { %2485 = vmatpush3.bf16.msra.mxu0 %v2784_v52  ;;  %v2258_v52 = vcombine.high %v379_v44, %v383_v45 }
  0x92   : > { %2549 = vmatpush3.bf16.msra.mxu1 %v2786_v55  ;;  %2486 = vmatprep.subr.bf16.mxu0 %v2787_v62  ;;  %v390_v55 = vld [vmem:[%s3267_s21 + $0x1e0] sm:$0xff]  ;;  %v332_v62 = vld [vmem:[%s3267_s21 + $0x10] sm:$0xff] }
  0x93   : > { %2550 = vmatprep.subr.bf16.mxu1 %v2789_v0  ;;  %v333_v0 = vld [vmem:[%s3267_s21 + $0x18] sm:$0xff] }
  0x94   : > { %1274 = vmatmul.mubr.bf16.gmra.mrb[4].mxu0 %v2215_v51  ;;  %v2809_v51 = vld [vmem:[#allocation5 + $0x1f8] sm:$0xff]  }
  0x95   : > { %1371 = vmatmul.mubr.bf16.gmra.mrb[4].mxu1 %v2217_v53  ;;  %1281 = vmatprep.mubr.bf16.mxu0 %v2224_v60  ;;  %v2810_v53 = vld [vmem:[#allocation5 + $0x1b8] sm:$0xff]   ;;  %v2264_v60 = vcombine.high %v386_v54, %v390_v55 }
  0x96   : > { %1378 = vmatprep.mubr.bf16.mxu1 %v2226_v61  ;;  %2487 = vmatpush3.bf16.msra.mxu0 %v2788_v63  ;;  %v2266_v61 = vcombine.high %v387_v56, %v391_v57  ;;  %v336_v63 = vld [vmem:[%s3267_s21 + $0x30] sm:$0xff]  ;;  %v389_v56 = vld [vmem:[%s3267_s21 + $0x1d8] sm:$0xff] }
  0x97   : > { %2551 = vmatpush3.bf16.msra.mxu1 %v2790_v1  ;;  %2488 = vmatprep.subr.bf16.mxu0 %v2791_v10  ;;  %v337_v1 = vld [vmem:[%s3267_s21 + $0x38] sm:$0xff]  ;;  %v2212_v4 = vcombine.high %v332_v62, %v336_v63  ;;  %v2211_v10 = vcombine.low %v332_v62, %v336_v63 }
  0x98   : > { %2552 = vmatprep.subr.bf16.mxu1 %v2793_v12  ;;  %v2214_v5 = vcombine.high %v333_v0, %v337_v1  ;;  %v393_v57 = vld [vmem:[%s3267_s21 + $0x1f8] sm:$0xff] }
  0x99   : > { %v2269_v63 = vcombine.low %v389_v56, %v393_v57 }
  0x9a   : > { %2489 = vmatpush3.bf16.msra.mxu0 %v2792_v11  ;;  %v2213_v11 = vcombine.low %v333_v0, %v337_v1  ;;  %v2811_v0 = vld [vmem:[#allocation7] sm:$0xff]   ;;  %v2812_v1 = vld [vmem:[#allocation7 + $0x8] sm:$0xff]  }
  0x9b   : > { %2553 = vmatpush3.bf16.msra.mxu1 %v2794_v13  ;;  %2490 = vmatprep.subr.bf16.mxu0 %v2795_v18 }
  0x9c   : > { %1282 = vmatmul.mubr.bf16.gmra.mrb[8].mxu0 %v2223_v2  ;;  %2554 = vmatprep.subr.bf16.mxu1 %v2797_v23  ;;  %v2263_v2 = vcombine.low %v386_v54, %v390_v55  ;;  %v360_v23 = vld [vmem:[%s3267_s21 + $0xf0] sm:$0xff] }
  0x9d   : > { %1379 = vmatmul.mubr.bf16.gmra.mrb[8].mxu1 %v2225_v6  ;;  %1289 = vmatprep.mubr.bf16.mxu0 %v2232_v7  ;;  %v340_v6 = vld [vmem:[%s3267_s21 + $0x50] sm:$0xff] }
  0x9e   : > { %1386 = vmatprep.mubr.bf16.mxu1 %v2234_v9  ;;  %2491 = vmatpush3.bf16.msra.mxu0 %v2796_v20  ;;  %v344_v7 = vld [vmem:[%s3267_s21 + $0x70] sm:$0xff]  ;;  %v345_v9 = vld [vmem:[%s3267_s21 + $0x78] sm:$0xff]  ;;  %v2228_v20 = vcombine.high %v348_v14, %v352_v15 }
  0x9f   : > { %2555 = vmatpush3.bf16.msra.mxu1 %v2798_v25  ;;  %2492 = vmatprep.subr.bf16.mxu0 %v2799_v28  ;;  %v2220_v12 = vcombine.high %v340_v6, %v344_v7  ;;  %v2222_v13 = vcombine.high %v341_v8, %v345_v9  ;;  %v2219_v18 = vcombine.low %v340_v6, %v344_v7  ;;  %v361_v25 = vld [vmem:[%s3267_s21 + $0xf8] sm:$0xff]  ;;  %v388_v54 = vld [vmem:[%s3267_s21 + $0x1d0] sm:$0xff] }
  0xa0   : > { %2556 = vmatprep.subr.bf16.mxu1 %v2801_v32  ;;  %v365_v32 = vld [vmem:[%s3267_s21 + $0x118] sm:$0xff]  ;;  %v392_v55 = vld [vmem:[%s3267_s21 + $0x1f0] sm:$0xff] }
  0xa1   : > { %v2267_v62 = vcombine.low %v388_v54, %v392_v55  ;;  %v2817_v6 = vld [vmem:[#allocation7 + $0x30] sm:$0xff]   ;;  %v2818_v7 = vld [vmem:[#allocation7 + $0x38] sm:$0xff]  }
  0xa2   : > { %2493 = vmatpush3.bf16.msra.mxu0 %v2800_v31  ;;  %v368_v31 = vld [vmem:[%s3267_s21 + $0x130] sm:$0xff] }
  0xa3   : > { %2557 = vmatpush3.bf16.msra.mxu1 %v2802_v33  ;;  %2494 = vmatprep.subr.bf16.mxu0 %v2803_v38  ;;  %v369_v33 = vld [vmem:[%s3267_s21 + $0x138] sm:$0xff]  ;;  %v372_v38 = vld [vmem:[%s3267_s21 + $0x150] sm:$0xff]  ;;  %v2243_v42 = vcombine.low %v364_v30, %v368_v31 }
  0xa4   : > { %1290 = vmatmul.mubr.bf16.gmra.mrb[12].mxu0 %v2231_v19  ;;  %2558 = vmatprep.subr.bf16.mxu1 %v2805_v40  ;;  %v2221_v19 = vcombine.low %v341_v8, %v345_v9  ;;  %v373_v40 = vld [vmem:[%s3267_s21 + $0x158] sm:$0xff] }
  0xa5   : > { %1387 = vmatmul.mubr.bf16.gmra.mrb[12].mxu1 %v2233_v21  ;;  %1297 = vmatprep.mubr.bf16.mxu0 %v2240_v22  ;;  %v2230_v21 = vcombine.high %v349_v16, %v353_v17  ;;  %v356_v22 = vld [vmem:[%s3267_s21 + $0xd0] sm:$0xff]  ;;  %v2254_v45 = vcombine.high %v373_v40, %v377_v41 }
  0xa6   : > { %1394 = vmatprep.mubr.bf16.mxu1 %v2242_v24  ;;  %2495 = vmatpush3.bf16.msra.mxu0 %v2804_v39  ;;  %v357_v24 = vld [vmem:[%s3267_s21 + $0xd8] sm:$0xff]  ;;  %v2236_v28 = vcombine.high %v356_v22, %v360_v23  ;;  %v376_v39 = vld [vmem:[%s3267_s21 + $0x170] sm:$0xff] }
  0xa7   : > { %2559 = vmatpush3.bf16.msra.mxu1 %v2806_v43  ;;  %2496 = vmatprep.subr.bf16.mxu0 %v2807_v46  ;;  %v2238_v29 = vcombine.high %v357_v24, %v361_v25  ;;  %v2245_v43 = vcombine.low %v365_v32, %v369_v33  ;;  %v2252_v44 = vcombine.high %v372_v38, %v376_v39  ;;  %v380_v46 = vld [vmem:[%s3267_s21 + $0x190] sm:$0xff] }
  0xa8   : > { %2560 = vmatprep.subr.bf16.mxu1 %v2809_v51  ;;  %v2253_v51 = vcombine.low %v373_v40, %v377_v41 }
  0xaa   : > { %2497 = vmatpush3.bf16.msra.mxu0 %v2808_v48  ;;  %v381_v48 = vld [vmem:[%s3267_s21 + $0x198] sm:$0xff] }
  0xab   : > { %2561 = vmatpush3.bf16.msra.mxu1 %v2810_v53  ;;  %2626 = vmatprep.subr.bf16.mxu0 %v2811_v0 }
  0xac   : > { %1298 = vmatmul.mubr.bf16.gmra.mrb[16].mxu0 %v2239_v34  ;;  %v2235_v34 = vcombine.low %v356_v22, %v360_v23  ;;  %2658 = vmatprep.subr.bf16.mxu1 %v2811_v0 }
  0xad   : > { %1395 = vmatmul.mubr.bf16.gmra.mrb[16].mxu1 %v2241_v35  ;;  %1305 = vmatprep.mubr.bf16.mxu0 %v2248_v36  ;;  %v2237_v35 = vcombine.low %v357_v24, %v361_v25  ;;  %v2244_v36 = vcombine.high %v364_v30, %v368_v31 }
  0xae   : > { %1402 = vmatprep.mubr.bf16.mxu1 %v2250_v37  ;;  %v2246_v37 = vcombine.high %v365_v32, %v369_v33 }
  0xb4   : > { %1306 = vmatmul.mubr.bf16.gmra.mrb[20].mxu0 %v2247_v47  ;;  %v384_v47 = vld [vmem:[%s3267_s21 + $0x1b0] sm:$0xff] }
  0xb5   : > { %1403 = vmatmul.mubr.bf16.gmra.mrb[20].mxu1 %v2249_v49  ;;  %1313 = vmatprep.mubr.bf16.mxu0 %v2256_v50  ;;  %v385_v49 = vld [vmem:[%s3267_s21 + $0x1b8] sm:$0xff]  ;;  %v2251_v50 = vcombine.low %v372_v38, %v376_v39 }
  0xb6   : > { %1410 = vmatprep.mubr.bf16.mxu1 %v2258_v52  ;;  %v2260_v52 = vcombine.high %v380_v46, %v384_v47  ;;  %v2262_v53 = vcombine.high %v381_v48, %v385_v49 }
  0xbc   : > { %1314 = vmatmul.mubr.bf16.gmra.mrb[24].mxu0 %v2255_v58  ;;  %v2259_v58 = vcombine.low %v380_v46, %v384_v47 }
  0xbd   : > { %1411 = vmatmul.mubr.bf16.gmra.mrb[24].mxu1 %v2257_v59  ;;  %1321 = vmatprep.mubr.bf16.mxu0 %v2264_v60  ;;  %v2261_v59 = vcombine.low %v381_v48, %v385_v49  ;;  %v2268_v60 = vcombine.high %v388_v54, %v392_v55 }
  0xbe   : > { %1418 = vmatprep.mubr.bf16.mxu1 %v2266_v61  ;;  %v2270_v61 = vcombine.high %v389_v56, %v393_v57 }
  0xc4   : > { %1322 = vmatmul.mubr.bf16.gmra.mrb[28].mxu0 %v2263_v2  ;;  %v2813_v2 = vld [vmem:[#allocation7 + $0x10] sm:$0xff]  }
  0xc5   : > { %1419 = vmatmul.mubr.bf16.gmra.mrb[28].mxu1 %v2265_v3  ;;  %1459 = vmatprep.mubr.bf16.mxu0 %v2212_v4  ;;  %v2814_v3 = vld [vmem:[#allocation7 + $0x18] sm:$0xff]   ;;  %v2815_v4 = vld [vmem:[#allocation7 + $0x20] sm:$0xff]  }
  0xc6   : > { %1556 = vmatprep.mubr.bf16.mxu1 %v2214_v5  ;;  %v2816_v5 = vld [vmem:[#allocation7 + $0x28] sm:$0xff]  }
  0xcc   : > { %1460 = vmatmul.mubr.bf16.vlgmr.msra.gmra.mrb[32].mxu0 %v2211_v10  ;;  %v3344_v10 = vld [vmem:[%s3674_s2] ss:$0 sm:$0xff] }
  0xcd   : > { %1557 = vmatmul.mubr.bf16.vlgmr.msra.gmra.mrb[32].mxu1 %v2213_v11  ;;  %1467 = vmatprep.mubr.bf16.mxu0 %v2220_v12 }
  0xce   : > { %1564 = vmatprep.mubr.bf16.mxu1 %v2222_v13  ;;  %2627 = vmatpush3.bf16.msra.mxu0 %v2811_v0 }
  0xcf   : > { %2666 = vmatpush3.bf16.msra.mxu1 %v2811_v0  ;;  %2628 = vmatprep.subr.bf16.mxu0 %v2812_v1 }
  0xd0   : > { %2659 = vmatprep.subr.bf16.mxu1 %v2812_v1 }
  0xd2   : > { %2629 = vmatpush3.bf16.msra.mxu0 %v2812_v1 }
  0xd3   : > { %2667 = vmatpush3.bf16.msra.mxu1 %v2812_v1  ;;  %2630 = vmatprep.subr.bf16.mxu0 %v2813_v2 }
  0xd4   : > { %1468 = vmatmul.mubr.bf16.gmra.mrb[36].mxu0 %v2219_v18  ;;  %2660 = vmatprep.subr.bf16.mxu1 %v2813_v2 }
  0xd5   : > { %1565 = vmatmul.mubr.bf16.gmra.mrb[36].mxu1 %v2221_v19  ;;  %1475 = vmatprep.mubr.bf16.mxu0 %v2228_v20 }
  0xd6   : > { %1572 = vmatprep.mubr.bf16.mxu1 %v2230_v21  ;;  %2631 = vmatpush3.bf16.msra.mxu0 %v2813_v2 }
  0xd7   : > { %2668 = vmatpush3.bf16.msra.mxu1 %v2813_v2  ;;  %2632 = vmatprep.subr.bf16.mxu0 %v2814_v3 }
  0xd8   : > { %2661 = vmatprep.subr.bf16.mxu1 %v2814_v3 }
  0xda   : > { %2633 = vmatpush3.bf16.msra.mxu0 %v2814_v3 }
  0xdb   : > { %2669 = vmatpush3.bf16.msra.mxu1 %v2814_v3  ;;  %2634 = vmatprep.subr.bf16.mxu0 %v2815_v4 }
  0xdc   : > { %1476 = vmatmul.mubr.bf16.gmra.mrb[40].mxu0 %v2227_v26  ;;  %2662 = vmatprep.subr.bf16.mxu1 %v2815_v4 }
  0xdd   : > { %1573 = vmatmul.mubr.bf16.gmra.mrb[40].mxu1 %v2229_v27  ;;  %1483 = vmatprep.mubr.bf16.mxu0 %v2236_v28 }
  0xde   : > { %1580 = vmatprep.mubr.bf16.mxu1 %v2238_v29  ;;  %2635 = vmatpush3.bf16.msra.mxu0 %v2815_v4 }
  0xdf   : > { %2670 = vmatpush3.bf16.msra.mxu1 %v2815_v4  ;;  %2636 = vmatprep.subr.bf16.mxu0 %v2816_v5 }
  0xe0   : > { %2663 = vmatprep.subr.bf16.mxu1 %v2816_v5 }
  0xe2   : > { %2637 = vmatpush3.bf16.msra.mxu0 %v2816_v5 }
  0xe3   : > { %2671 = vmatpush3.bf16.msra.mxu1 %v2816_v5  ;;  %2638 = vmatprep.subr.bf16.mxu0 %v2817_v6 }
  0xe4   : > { %1484 = vmatmul.mubr.bf16.gmra.mrb[44].mxu0 %v2235_v34  ;;  %2664 = vmatprep.subr.bf16.mxu1 %v2817_v6 }
  0xe5   : > { %1581 = vmatmul.mubr.bf16.gmra.mrb[44].mxu1 %v2237_v35  ;;  %1491 = vmatprep.mubr.bf16.mxu0 %v2244_v36 }
  0xe6   : > { %1588 = vmatprep.mubr.bf16.mxu1 %v2246_v37  ;;  %2639 = vmatpush3.bf16.msra.mxu0 %v2817_v6 }
  0xe7   : > { %2672 = vmatpush3.bf16.msra.mxu1 %v2817_v6  ;;  %2640 = vmatprep.subr.bf16.mxu0 %v2818_v7 }
  0xe8   : > { %2665 = vmatprep.subr.bf16.mxu1 %v2818_v7 }
  0xea   : > { %2641 = vmatpush3.bf16.msra.mxu0 %v2818_v7 }
  0xeb   : > { %2673 = vmatpush3.bf16.msra.mxu1 %v2818_v7 }
  0xec   : > { %1492 = vmatmul.mubr.bf16.gmra.mrb[48].mxu0 %v2243_v42 }
  0xed   : > { %1589 = vmatmul.mubr.bf16.gmra.mrb[48].mxu1 %v2245_v43  ;;  %1499 = vmatprep.mubr.bf16.mxu0 %v2252_v44 }
  0xee   : > { %1596 = vmatprep.mubr.bf16.mxu1 %v2254_v45 }
  0xf4   : > { %1500 = vmatmul.mubr.bf16.gmra.mrb[52].mxu0 %v2251_v50 }
  0xf5   : > { %1597 = vmatmul.mubr.bf16.gmra.mrb[52].mxu1 %v2253_v51  ;;  %1507 = vmatprep.mubr.bf16.mxu0 %v2260_v52 }
  0xf6   : > { %1604 = vmatprep.mubr.bf16.mxu1 %v2262_v53 }
  0xfc   : > { %1508 = vmatmul.mubr.bf16.gmra.mrb[56].mxu0 %v2259_v58 }
  0xfd   : > { %1605 = vmatmul.mubr.bf16.gmra.mrb[56].mxu1 %v2261_v59  ;;  %1515 = vmatprep.mubr.bf16.mxu0 %v2268_v60 }
  0xfe   : > { %1612 = vmatprep.mubr.bf16.mxu1 %v2270_v61 }
 0x104   : > { %1516 = vmatmul.mubr.bf16.gmra.mrb[60].mxu0 %v2267_v62 }
 0x105   : > { %1613 = vmatmul.mubr.bf16.gmra.mrb[60].mxu1 %v2269_v63 }
 0x15f   : > { %v2370_v8 = vpop.f32.mrb[0].mxu0 }
 0x160   : > { %v2434_v9 = vpop.f32.mrb[0].mxu1  ;;  %v2371_v11 = vpop.f32.mrb[1].mxu0 }
 0x161   : > { %v2372_v12 = vadd.f32 %v2371_v11, %v2370_v8  ;;  %v2435_v13 = vpop.f32.mrb[1].mxu1  ;;  %v2373_v14 = vpop.f32.mrb[2].mxu0 }
 0x162   : > { %v2436_v15 = vadd.f32 %v2435_v13, %v2434_v9  ;;  %v2437_v16 = vpop.f32.mrb[2].mxu1  ;;  %v2374_v17 = vpop.f32.mrb[3].mxu0 }
 0x163   : > { %v1268_v18 = vadd.f32 %v2372_v12, %v3344_v10  ;;  %v2375_v19 = vadd.f32 %v2374_v17, %v2373_v14  ;;  %v2438_v20 = vpop.f32.mrb[3].mxu1 }
 0x164   : > { %v2439_v21 = vadd.f32 %v2438_v20, %v2437_v16 }
 0x165   : > { %v3347_v22 = vadd.f32 %v2436_v15, %v1268_v18  ;;  %v1271_v23 = vadd.f32 %v2375_v19, %v3344_v10 }
 0x167   : > { %v3350_v24 = vadd.f32 %v2439_v21, %v1271_v23  ;;  %v2376_v25 = vpop.f32.mrb[4].mxu0 }
 0x168   : > { %v2440_v26 = vpop.f32.mrb[4].mxu1  ;;  %v2377_v27 = vpop.f32.mrb[5].mxu0 }
 0x169   : > { %v2378_v28 = vadd.f32 %v2377_v27, %v2376_v25  ;;  %v2441_v29 = vpop.f32.mrb[5].mxu1  ;;  %v2379_v30 = vpop.f32.mrb[6].mxu0 }
 0x16a   : > { %v2442_v31 = vadd.f32 %v2441_v29, %v2440_v26  ;;  %v2443_v32 = vpop.f32.mrb[6].mxu1  ;;  %v2380_v33 = vpop.f32.mrb[7].mxu0 }
 0x16b   : > { %v1276_v34 = vadd.f32 %v2378_v28, %v3344_v10  ;;  %v2381_v35 = vadd.f32 %v2380_v33, %v2379_v30  ;;  %v2444_v36 = vpop.f32.mrb[7].mxu1 }
 0x16c   : > { %v2445_v37 = vadd.f32 %v2444_v36, %v2443_v32 }
 0x16d   : > { %v3353_v38 = vadd.f32 %v2442_v31, %v1276_v34  ;;  %v1279_v39 = vadd.f32 %v2381_v35, %v3344_v10 }
 0x16f   : > { %v3356_v40 = vadd.f32 %v2445_v37, %v1279_v39  ;;  %v2382_v41 = vpop.f32.mrb[8].mxu0 }
 0x170   : > { %v2446_v42 = vpop.f32.mrb[8].mxu1  ;;  %v2383_v43 = vpop.f32.mrb[9].mxu0 }
 0x171   : > { %v2384_v44 = vadd.f32 %v2383_v43, %v2382_v41  ;;  %v2447_v45 = vpop.f32.mrb[9].mxu1  ;;  %v2385_v46 = vpop.f32.mrb[10].mxu0 }
 0x172   : > { %v2448_v47 = vadd.f32 %v2447_v45, %v2446_v42  ;;  %v2449_v48 = vpop.f32.mrb[10].mxu1  ;;  %v2386_v49 = vpop.f32.mrb[11].mxu0 }
 0x173   : > { %v1284_v50 = vadd.f32 %v2384_v44, %v3344_v10  ;;  %v2387_v51 = vadd.f32 %v2386_v49, %v2385_v46  ;;  %v2450_v52 = vpop.f32.mrb[11].mxu1 }
 0x174   : > { %v2451_v53 = vadd.f32 %v2450_v52, %v2449_v48 }
 0x175   : > { %v3359_v54 = vadd.f32 %v2448_v47, %v1284_v50  ;;  %v1287_v55 = vadd.f32 %v2387_v51, %v3344_v10 }
 0x177   : > { %v3362_v56 = vadd.f32 %v2451_v53, %v1287_v55  ;;  %v2388_v57 = vpop.f32.mrb[12].mxu0 }
 0x178   : > { %v2452_v58 = vpop.f32.mrb[12].mxu1  ;;  %v2389_v59 = vpop.f32.mrb[13].mxu0 }
 0x179   : > { %v2390_v60 = vadd.f32 %v2389_v59, %v2388_v57  ;;  %v2453_v61 = vpop.f32.mrb[13].mxu1  ;;  %v2391_v62 = vpop.f32.mrb[14].mxu0 }
 0x17a   : > { %v2454_v63 = vadd.f32 %v2453_v61, %v2452_v58  ;;  %v2455_v0 = vpop.f32.mrb[14].mxu1  ;;  %v2392_v1 = vpop.f32.mrb[15].mxu0 }
 0x17b   : > { %v1292_v2 = vadd.f32 %v2390_v60, %v3344_v10  ;;  %v2393_v3 = vadd.f32 %v2392_v1, %v2391_v62  ;;  %v2456_v4 = vpop.f32.mrb[15].mxu1 }
 0x17c   : > { %v2457_v5 = vadd.f32 %v2456_v4, %v2455_v0 }
 0x17d   : > { %v3365_v6 = vadd.f32 %v2454_v63, %v1292_v2  ;;  %v1295_v7 = vadd.f32 %v2393_v3, %v3344_v10 }
 0x17f   : > { %v3368_v8 = vadd.f32 %v2457_v5, %v1295_v7  ;;  %v2394_v9 = vpop.f32.mrb[16].mxu0 }
 0x180   : > { %v2458_v11 = vpop.f32.mrb[16].mxu1  ;;  %v2395_v12 = vpop.f32.mrb[17].mxu0 }
 0x181   : > { %v2396_v13 = vadd.f32 %v2395_v12, %v2394_v9  ;;  %v2459_v14 = vpop.f32.mrb[17].mxu1  ;;  %v2397_v15 = vpop.f32.mrb[18].mxu0 }
 0x182   : > { %v2460_v16 = vadd.f32 %v2459_v14, %v2458_v11  ;;  %v2461_v17 = vpop.f32.mrb[18].mxu1  ;;  %v2398_v18 = vpop.f32.mrb[19].mxu0 }
 0x183   : > { %v1300_v19 = vadd.f32 %v2396_v13, %v3344_v10  ;;  %v2399_v20 = vadd.f32 %v2398_v18, %v2397_v15  ;;  %v2462_v21 = vpop.f32.mrb[19].mxu1 }
 0x184   : > { %v2463_v23 = vadd.f32 %v2462_v21, %v2461_v17 }
 0x185   : > { %v3371_v25 = vadd.f32 %v2460_v16, %v1300_v19  ;;  %v1303_v26 = vadd.f32 %v2399_v20, %v3344_v10 }
 0x187   : > { %v3374_v27 = vadd.f32 %v2463_v23, %v1303_v26  ;;  %v2400_v28 = vpop.f32.mrb[20].mxu0 }
 0x188   : > { %v2464_v29 = vpop.f32.mrb[20].mxu1  ;;  %v2401_v30 = vpop.f32.mrb[21].mxu0 }
 0x189   : > { %v2402_v31 = vadd.f32 %v2401_v30, %v2400_v28  ;;  %v2465_v32 = vpop.f32.mrb[21].mxu1  ;;  %v2403_v33 = vpop.f32.mrb[22].mxu0 }
 0x18a   : > { %v2466_v34 = vadd.f32 %v2465_v32, %v2464_v29  ;;  %v2467_v35 = vpop.f32.mrb[22].mxu1  ;;  %v2404_v36 = vpop.f32.mrb[23].mxu0 }
 0x18b   : > { %v1308_v37 = vadd.f32 %v2402_v31, %v3344_v10  ;;  %v2405_v39 = vadd.f32 %v2404_v36, %v2403_v33  ;;  %v2468_v41 = vpop.f32.mrb[23].mxu1 }
 0x18c   : > { %v2469_v42 = vadd.f32 %v2468_v41, %v2467_v35 }
 0x18d   : > { %v3377_v43 = vadd.f32 %v2466_v34, %v1308_v37  ;;  %v1311_v44 = vadd.f32 %v2405_v39, %v3344_v10 }
 0x18f   : > { %v3380_v45 = vadd.f32 %v2469_v42, %v1311_v44  ;;  %v2406_v46 = vpop.f32.mrb[24].mxu0 }
 0x190   : > { %v2470_v47 = vpop.f32.mrb[24].mxu1  ;;  %v2407_v48 = vpop.f32.mrb[25].mxu0 }
 0x191   : > { %v2408_v49 = vadd.f32 %v2407_v48, %v2406_v46  ;;  %v2471_v50 = vpop.f32.mrb[25].mxu1  ;;  %v2409_v51 = vpop.f32.mrb[26].mxu0 }
 0x192   : > { %v2472_v52 = vadd.f32 %v2471_v50, %v2470_v47  ;;  %v2473_v53 = vpop.f32.mrb[26].mxu1  ;;  %v2410_v55 = vpop.f32.mrb[27].mxu0 }
 0x193   : > { %v1316_v57 = vadd.f32 %v2408_v49, %v3344_v10  ;;  %v2411_v58 = vadd.f32 %v2410_v55, %v2409_v51  ;;  %v2474_v59 = vpop.f32.mrb[27].mxu1 }
 0x194   : > { %v2475_v60 = vadd.f32 %v2474_v59, %v2473_v53 }
 0x195   : > { %v3383_v61 = vadd.f32 %v2472_v52, %v1316_v57  ;;  %v1319_v62 = vadd.f32 %v2411_v58, %v3344_v10 }
 0x197   : > { %v3386_v63 = vadd.f32 %v2475_v60, %v1319_v62  ;;  %v2412_v0 = vpop.f32.mrb[28].mxu0 }
 0x198   : > { %v2476_v1 = vpop.f32.mrb[28].mxu1  ;;  %v2413_v2 = vpop.f32.mrb[29].mxu0 }
 0x199   : > { %v2414_v3 = vadd.f32 %v2413_v2, %v2412_v0  ;;  %v2477_v4 = vpop.f32.mrb[29].mxu1  ;;  %v2415_v5 = vpop.f32.mrb[30].mxu0 }
 0x19a   : > { %v2478_v7 = vadd.f32 %v2477_v4, %v2476_v1  ;;  %v2479_v9 = vpop.f32.mrb[30].mxu1  ;;  %v2416_v11 = vpop.f32.mrb[31].mxu0 }
 0x19b   : > { %v1324_v12 = vadd.f32 %v2414_v3, %v3344_v10  ;;  %v2417_v13 = vadd.f32 %v2416_v11, %v2415_v5  ;;  %v2480_v14 = vpop.f32.mrb[31].mxu1 }
 0x19c   : > { %v2481_v15 = vadd.f32 %v2480_v14, %v2479_v9 }
 0x19d   : > { %v3389_v16 = vadd.f32 %v2478_v7, %v1324_v12  ;;  %v1327_v17 = vadd.f32 %v2417_v13, %v3344_v10 }
 0x19f   : > { %v3392_v18 = vadd.f32 %v2481_v15, %v1327_v17  ;;  %v2498_v19 = vpop.f32.mrb[32].mxu0 }
 0x1a0   : > { %v2562_v20 = vpop.f32.mrb[32].mxu1  ;;  %v2499_v21 = vpop.f32.mrb[33].mxu0 }
 0x1a1   : > { %v2500_v23 = vadd.f32 %v2499_v21, %v2498_v19  ;;  %v2563_v26 = vpop.f32.mrb[33].mxu1  ;;  %v2501_v28 = vpop.f32.mrb[34].mxu0 }
 0x1a2   : > { %v2564_v29 = vadd.f32 %v2563_v26, %v2562_v20  ;;  %v2565_v30 = vpop.f32.mrb[34].mxu1  ;;  %v2502_v31 = vpop.f32.mrb[35].mxu0 }
 0x1a3   : > { %v1462_v32 = vadd.f32 %v2500_v23, %v3347_v22  ;;  %v2503_v33 = vadd.f32 %v2502_v31, %v2501_v28  ;;  %v2566_v34 = vpop.f32.mrb[35].mxu1 }
 0x1a4   : > { %v2567_v35 = vadd.f32 %v2566_v34, %v2565_v30 }
 0x1a5   : > { %v1559_v36 = vadd.f32 %v2564_v29, %v1462_v32  ;;  %v1465_v37 = vadd.f32 %v2503_v33, %v3350_v24 }
 0x1a7   : > { %v1562_v10 = vadd.f32 %v2567_v35, %v1465_v37  ;;  %v2504_v39 = vpop.f32.mrb[36].mxu0  ;;  %v1621_v44 = vmax.f32 %v1559_v36, 0.0 }
 0x1a8   : > { %v2568_v41 = vpop.f32.mrb[36].mxu1  ;;  %v2505_v42 = vpop.f32.mrb[37].mxu0 }
 0x1a9   : > { %v1622_v46 = vmax.f32 %v1562_v10, 0.0  ;;  %v2506_v47 = vadd.f32 %v2505_v42, %v2504_v39  ;;  %v2569_v48 = vpop.f32.mrb[37].mxu1  ;;  %v2507_v49 = vpop.f32.mrb[38].mxu0 }
 0x1aa   : > { %v2570_v50 = vadd.f32 %v2569_v48, %v2568_v41  ;;  %v2571_v51 = vpop.f32.mrb[38].mxu1  ;;  %v2508_v52 = vpop.f32.mrb[39].mxu0 }
 0x1ab   : > { %v1470_v22 = vadd.f32 %v2506_v47, %v3353_v38  ;;  %v2509_v53 = vadd.f32 %v2508_v52, %v2507_v49  ;;  %v2572_v55 = vpop.f32.mrb[39].mxu1  ;;  %v1637_v57 = vpack.c.bf16 %v1622_v46, %v1621_v44 }
 0x1ac   : > { %v2573_v58 = vadd.f32 %v2572_v55, %v2571_v51 }
 0x1ad   : > { %v1567_v59 = vadd.f32 %v2570_v50, %v1470_v22  ;;  %v1473_v24 = vadd.f32 %v2509_v53, %v3356_v40  ;;  %2642 = vmatprep.mubr.bf16.mxu0 %v1637_v57 }
 0x1af   : > { %v1570_v60 = vadd.f32 %v2573_v58, %v1473_v24  ;;  %v2510_v62 = vpop.f32.mrb[40].mxu0  ;;  %v1623_v2 = vmax.f32 %v1567_v59, 0.0 }
 0x1b0   : > { %v2574_v0 = vpop.f32.mrb[40].mxu1  ;;  %v2511_v1 = vpop.f32.mrb[41].mxu0 }
 0x1b1   : > { %v1624_v3 = vmax.f32 %v1570_v60, 0.0  ;;  %v2512_v4 = vadd.f32 %v2511_v1, %v2510_v62  ;;  %v2575_v5 = vpop.f32.mrb[41].mxu1  ;;  %v2513_v7 = vpop.f32.mrb[42].mxu0 }
 0x1b2   : > { %v2576_v9 = vadd.f32 %v2575_v5, %v2574_v0  ;;  %v2577_v11 = vpop.f32.mrb[42].mxu1  ;;  %v2514_v38 = vpop.f32.mrb[43].mxu0 }
 0x1b3   : > { %v1638_v12 = vpack.c.bf16 %v1624_v3, %v1623_v2  ;;  %v1478_v13 = vadd.f32 %v2512_v4, %v3359_v54  ;;  %v2515_v14 = vadd.f32 %v2514_v38, %v2513_v7  ;;  %v2578_v15 = vpop.f32.mrb[43].mxu1 }
 0x1b4   : > { %v2579_v17 = vadd.f32 %v2578_v15, %v2577_v11 }
 0x1b5   : > { %v1575_v40 = vadd.f32 %v2576_v9, %v1478_v13  ;;  %v1481_v19 = vadd.f32 %v2515_v14, %v3362_v56  ;;  %2643 = vmatmul.mubr.bf16.vlgmr.msra.gmra.mrb[64].mxu0 %v1638_v12 }
 0x1b7   : > { %v1578_v20 = vadd.f32 %v2579_v17, %v1481_v19  ;;  %v2516_v21 = vpop.f32.mrb[44].mxu0  ;;  %v1625_v28 = vmax.f32 %v1575_v40, 0.0 }
 0x1b8   : > { %v2580_v23 = vpop.f32.mrb[44].mxu1  ;;  %v2517_v26 = vpop.f32.mrb[45].mxu0 }
 0x1b9   : > { %v1626_v29 = vmax.f32 %v1578_v20, 0.0  ;;  %v2518_v30 = vadd.f32 %v2517_v26, %v2516_v21  ;;  %v2581_v31 = vpop.f32.mrb[45].mxu1  ;;  %v2519_v32 = vpop.f32.mrb[46].mxu0 }
 0x1ba   : > { %v2582_v33 = vadd.f32 %v2581_v31, %v2580_v23  ;;  %v2583_v34 = vpop.f32.mrb[46].mxu1  ;;  %v2520_v35 = vpop.f32.mrb[47].mxu0 }
 0x1bb   : > { %v1486_v54 = vadd.f32 %v2518_v30, %v3365_v6  ;;  %v2521_v36 = vadd.f32 %v2520_v35, %v2519_v32  ;;  %v2584_v37 = vpop.f32.mrb[47].mxu1  ;;  %v1639_v10 = vpack.c.bf16 %v1626_v29, %v1625_v28 }
 0x1bc   : > { %v2585_v39 = vadd.f32 %v2584_v37, %v2583_v34 }
 0x1bd   : > { %v1583_v56 = vadd.f32 %v2582_v33, %v1486_v54  ;;  %v1489_v41 = vadd.f32 %v2521_v36, %v3368_v8  ;;  %2646 = vmatprep.mubr.bf16.mxu0 %v1639_v10 }
 0x1bf   : > { %v1586_v42 = vadd.f32 %v2585_v39, %v1489_v41  ;;  %v2522_v44 = vpop.f32.mrb[48].mxu0  ;;  %v1627_v48 = vmax.f32 %v1583_v56, 0.0 }
 0x1c0   : > { %v2586_v46 = vpop.f32.mrb[48].mxu1  ;;  %v2523_v47 = vpop.f32.mrb[49].mxu0 }
 0x1c1   : > { %v1628_v49 = vmax.f32 %v1586_v42, 0.0  ;;  %v2524_v50 = vadd.f32 %v2523_v47, %v2522_v44  ;;  %v2587_v51 = vpop.f32.mrb[49].mxu1  ;;  %v2525_v52 = vpop.f32.mrb[50].mxu0 }
 0x1c2   : > { %v2588_v22 = vadd.f32 %v2587_v51, %v2586_v46  ;;  %v2589_v53 = vpop.f32.mrb[50].mxu1  ;;  %v2526_v6 = vpop.f32.mrb[51].mxu0 }
 0x1c3   : > { %v1494_v55 = vadd.f32 %v2524_v50, %v3371_v25  ;;  %v2527_v57 = vadd.f32 %v2526_v6, %v2525_v52  ;;  %v2590_v58 = vpop.f32.mrb[51].mxu1  ;;  %v1640_v59 = vpack.c.bf16 %v1628_v49, %v1627_v48 }
 0x1c4   : > { %v2591_v24 = vadd.f32 %v2590_v58, %v2589_v53 }
 0x1c5   : > { %v1591_v8 = vadd.f32 %v2588_v22, %v1494_v55  ;;  %v1497_v60 = vadd.f32 %v2527_v57, %v3374_v27  ;;  %2647 = vmatmul.mubr.bf16.gmra.mrb[68].mxu0 %v1640_v59 }
 0x1c7   : > { %v1594_v62 = vadd.f32 %v2591_v24, %v1497_v60  ;;  %v2528_v0 = vpop.f32.mrb[52].mxu0  ;;  %v1629_v3 = vmax.f32 %v1591_v8, 0.0  ;;  %v2335_v60 = vld [vmem:[%s3676_s4] ss:$0 sm:$0xff] }
 0x1c8   : > { %v2592_v1 = vpop.f32.mrb[52].mxu1  ;;  %v2529_v2 = vpop.f32.mrb[53].mxu0 }
 0x1c9   : > { %v1630_v4 = vmax.f32 %v1594_v62, 0.0  ;;  %v2530_v5 = vadd.f32 %v2529_v2, %v2528_v0  ;;  %v2593_v7 = vpop.f32.mrb[53].mxu1  ;;  %v2531_v9 = vpop.f32.mrb[54].mxu0 }
 0x1ca   : > { %v2594_v11 = vadd.f32 %v2593_v7, %v2592_v1  ;;  %v2595_v38 = vpop.f32.mrb[54].mxu1  ;;  %v2532_v25 = vpop.f32.mrb[55].mxu0 }
 0x1cb   : > { %v1502_v12 = vadd.f32 %v2530_v5, %v3377_v43  ;;  %v2533_v13 = vadd.f32 %v2532_v25, %v2531_v9  ;;  %v2596_v14 = vpop.f32.mrb[55].mxu1  ;;  %v1641_v15 = vpack.c.bf16 %v1630_v4, %v1629_v3 }
 0x1cc   : > { %v2597_v17 = vadd.f32 %v2596_v14, %v2595_v38 }
 0x1cd   : > { %v1599_v27 = vadd.f32 %v2594_v11, %v1502_v12  ;;  %v1505_v40 = vadd.f32 %v2533_v13, %v3380_v45  ;;  %2650 = vmatprep.mubr.bf16.mxu1 %v1641_v15 }
 0x1cf   : > { %v1602_v19 = vadd.f32 %v2597_v17, %v1505_v40  ;;  %v2534_v20 = vpop.f32.mrb[56].mxu0  ;;  %v1631_v26 = vmax.f32 %v1599_v27, 0.0 }
 0x1d0   : > { %v2598_v21 = vpop.f32.mrb[56].mxu1  ;;  %v2535_v23 = vpop.f32.mrb[57].mxu0 }
 0x1d1   : > { %v1632_v28 = vmax.f32 %v1602_v19, 0.0  ;;  %v2536_v29 = vadd.f32 %v2535_v23, %v2534_v20  ;;  %v2599_v30 = vpop.f32.mrb[57].mxu1  ;;  %v2537_v31 = vpop.f32.mrb[58].mxu0 }
 0x1d2   : > { %v2600_v32 = vadd.f32 %v2599_v30, %v2598_v21  ;;  %v2601_v33 = vpop.f32.mrb[58].mxu1  ;;  %v2538_v43 = vpop.f32.mrb[59].mxu0 }
 0x1d3   : > { %v1642_v34 = vpack.c.bf16 %v1632_v28, %v1631_v26  ;;  %v1510_v35 = vadd.f32 %v2536_v29, %v3383_v61  ;;  %v2539_v54 = vadd.f32 %v2538_v43, %v2537_v31  ;;  %v2602_v36 = vpop.f32.mrb[59].mxu1  ;;  %v1877_v43 = vlaneseq }
 0x1d4   : > { %v2603_v37 = vadd.f32 %v2602_v36, %v2601_v33 }
 0x1d5   : > { %v1607_v45 = vadd.f32 %v2600_v32, %v1510_v35  ;;  %v1513_v10 = vadd.f32 %v2539_v54, %v3386_v63  ;;  %2651 = vmatmul.mubr.bf16.vlgmr.msra.gmra.mrb[64].mxu1 %v1642_v34  ;;  %v3449_v34 = vand.u32 127, %v1877_v43 }
 0x1d7   : > { %v1610_v39 = vadd.f32 %v2603_v37, %v1513_v10  ;;  %v2540_v56 = vpop.f32.mrb[60].mxu0  ;;  %v1633_v44 = vmax.f32 %v1607_v45, 0.0  ;;  %vm1879_vm0 = vcmp.lt.s32.totalorder %v3449_v34, 32 }
 0x1d8   : > { %v2604_v41 = vpop.f32.mrb[60].mxu1  ;;  %v2541_v42 = vpop.f32.mrb[61].mxu0 }
 0x1d9   : > { %v1634_v46 = vmax.f32 %v1610_v39, 0.0  ;;  %v2542_v47 = vadd.f32 %v2541_v42, %v2540_v56  ;;  %v2605_v48 = vpop.f32.mrb[61].mxu1  ;;  %v2543_v49 = vpop.f32.mrb[62].mxu0 }
 0x1da   : > { %v2606_v50 = vadd.f32 %v2605_v48, %v2604_v41  ;;  %v2607_v51 = vpop.f32.mrb[62].mxu1  ;;  %v2544_v52 = vpop.f32.mrb[63].mxu0 }
 0x1db   : > { %v1518_v61 = vadd.f32 %v2542_v47, %v3389_v16  ;;  %v2545_v22 = vadd.f32 %v2544_v52, %v2543_v49  ;;  %v2608_v53 = vpop.f32.mrb[63].mxu1  ;;  %v1643_v6 = vpack.c.bf16 %v1634_v46, %v1633_v44 }
 0x1dc   : > { %v2609_v55 = vadd.f32 %v2608_v53, %v2607_v51 }
 0x1dd   : > { %v1615_v63 = vadd.f32 %v2606_v50, %v1518_v61  ;;  %v1521_v57 = vadd.f32 %v2545_v22, %v3392_v18  ;;  %2654 = vmatprep.mubr.bf16.mxu1 %v1643_v6 }
 0x1df   : > { %v1618_v58 = vadd.f32 %v2609_v55, %v1521_v57  ;;  %v1635_v59 = vmax.f32 %v1615_v63, 0.0 }
 0x1e1   : > { %v1636_v24 = vmax.f32 %v1618_v58, 0.0 }
 0x1e3   : > { %v1644_v8 = vpack.c.bf16 %v1636_v24, %v1635_v59 }
 0x1e5   : > { %2655 = vmatmul.mubr.bf16.gmra.mrb[68].mxu1 %v1644_v8 }
 0x288   : > { %v2644_v62 = vpop.f32.mrb[64].mxu0 }
 0x289   : > { %v1759_v0 = vadd.f32 %v2644_v62, %v2335_v60  ;;  %v1750_v16 = vpop.f32.mrb[65].mxu0 }
 0x28a   : > { %v1751_v1 = vadd.f32 %v2335_v60, %v1750_v16  ;;  %v2645_v2 = vpop.f32.mrb[66].mxu0 }
 0x28b   : > { %1817 = vadd.xlane.f32.xlu1 %v1759_v0  ;;  %v1753_v3 = vpop.f32.mrb[67].mxu0  ;;  %v1762_v4 = vadd.f32 %v2645_v2, %v2335_v60 }
 0x28c   : > { %1813 = vadd.xlane.f32.xlu0 %v1751_v1  ;;  %v1754_v18 = vadd.f32 %v2335_v60, %v1753_v3 }
 0x28f   : > { %1819 = vadd.xlane.f32.xlu1 %v1762_v4 }
 0x290   : > { %1815 = vadd.xlane.f32.xlu0 %v1754_v18 }
 0x298   : > { %v2648_v5 = vpop.f32.mrb[68].mxu0 }
 0x299   : > { %v3413_v7 = vadd.f32 %v2648_v5, %v2335_v60  ;;  %v1766_v9 = vpop.f32.mrb[69].mxu0 }
 0x29a   : > { %v2649_v11 = vpop.f32.mrb[70].mxu0  ;;  %v3418_v12 = vadd.f32 %v2335_v60, %v1766_v9 }
 0x29b   : > { %v3415_v38 = vadd.f32 %v2649_v11, %v2335_v60  ;;  %v1769_v25 = vpop.f32.mrb[71].mxu0  ;;  %1825 = vadd.xlane.f32.xlu0 %v3413_v7 }
 0x29c   : > { %v3421_v13 = vadd.f32 %v2335_v60, %v1769_v25 }
 0x29d   : > { %1827 = vadd.xlane.f32.xlu1 %v3415_v38 }
 0x29f   : > { %1821 = vadd.xlane.f32.xlu0 %v3418_v12 }
 0x2a1   : > { %1823 = vadd.xlane.f32.xlu1 %v3421_v13 }
 0x2a8   : > { %v2652_v14 = vpop.f32.mrb[64].mxu1 }
 0x2a9   : > { %v3425_v15 = vadd.f32 %v2652_v14, %v2335_v60  ;;  %v1782_v17 = vpop.f32.mrb[65].mxu1 }
 0x2aa   : > { %v2653_v27 = vpop.f32.mrb[66].mxu1  ;;  %v3430_v20 = vadd.f32 %v2335_v60, %v1782_v17 }
 0x2ab   : > { %v3427_v40 = vadd.f32 %v2653_v27, %v2335_v60  ;;  %v1785_v19 = vpop.f32.mrb[67].mxu1  ;;  %1833 = vadd.xlane.f32.xlu0 %v3425_v15 }
 0x2ac   : > { %v3433_v21 = vadd.f32 %v2335_v60, %v1785_v19 }
 0x2ad   : > { %1835 = vadd.xlane.f32.xlu1 %v3427_v40 }
 0x2af   : > { %1829 = vadd.xlane.f32.xlu0 %v3430_v20 }
 0x2b1   : > { %1831 = vadd.xlane.f32.xlu1 %v3433_v21 }
 0x2b8   : > { %v2656_v23 = vpop.f32.mrb[68].mxu1 }
 0x2b9   : > { %v1798_v26 = vpop.f32.mrb[69].mxu1  ;;  %v3442_v32 = vadd.f32 %v2656_v23, %v2335_v60 }
 0x2ba   : > { %v3437_v28 = vadd.f32 %v2335_v60, %v1798_v26  ;;  %v2657_v29 = vpop.f32.mrb[70].mxu1 }
 0x2bb   : > { %v1801_v30 = vpop.f32.mrb[71].mxu1  ;;  %v3445_v33 = vadd.f32 %v2657_v29, %v2335_v60 }
 0x2bc   : > { %v3439_v31 = vadd.f32 %v2335_v60, %v1801_v30  ;;  %1837 = vadd.xlane.f32.xlu0 %v3437_v28 }
 0x2be   : > { %1839 = vadd.xlane.f32.xlu1 %v3439_v31 }
 0x2c0   : > { %1841 = vadd.xlane.f32.xlu0 %v3442_v32 }
 0x2c2   : > { %1843 = vadd.xlane.f32.xlu1 %v3445_v33 }
 0x318   : > { %v1818_v35 = vpop.xlane.xlu1 %1817 }
 0x319   : > { %v1847_v54 = vmul.f32 0.03125, %v1818_v35  ;;  %v1814_v36 = vpop.xlane.xlu0 %1813 }
 0x31a   : > { %v1845_v37 = vmul.f32 0.03125, %v1814_v36 }
 0x31b   : > { %v3452_v45 = vsub.f32 %v1759_v0, %v1847_v54 }
 0x31c   : > { %v3454_v10 = vsub.f32 %v1751_v1, %v1845_v37  ;;  %v1820_v39 = vpop.xlane.xlu1 %1819 }
 0x31d   : > { %v1848_v56 = vmul.f32 0.03125, %v1820_v39  ;;  %v1816_v41 = vpop.xlane.xlu0 %1815  ;;  %v1882_v42 = vsel %vm1879_vm0, %v3452_v45, 0.0 }
 0x31e   : > { %v1846_v44 = vmul.f32 0.03125, %v1816_v41  ;;  %v1898_v46 = vmul.f32 %v1882_v42, %v1882_v42  ;;  %v1880_v48 = vsel %vm1879_vm0, %v3454_v10, 0.0 }
 0x31f   : > { %v3459_v47 = vsub.f32 %v1762_v4, %v1848_v56  ;;  %v1896_v52 = vmul.f32 %v1880_v48, %v1880_v48 }
 0x320   : > { %v3464_v49 = vsub.f32 %v1754_v18, %v1846_v44  ;;  %1916 = vadd.xlane.f32.xlu0 %v1898_v46 }
 0x321   : > { %v1883_v50 = vsel %vm1879_vm0, %v3459_v47, 0.0 }
 0x322   : > { %v1899_v51 = vmul.f32 %v1883_v50, %v1883_v50  ;;  %v1881_v61 = vsel %vm1879_vm0, %v3464_v49, 0.0 }
 0x323   : > { %v1897_v22 = vmul.f32 %v1881_v61, %v1881_v61 }
 0x324   : > { %1918 = vadd.xlane.f32.xlu1 %v1899_v51  ;;  %1912 = vadd.xlane.f32.xlu0 %v1896_v52 }
 0x328   : > { %1914 = vadd.xlane.f32.xlu1 %v1897_v22  ;;  %v1826_v53 = vpop.xlane.xlu0 %1825 }
 0x329   : > { %v1851_v6 = vmul.f32 0.03125, %v1826_v53 }
 0x32a   : > { %v1828_v55 = vpop.xlane.xlu1 %1827 }
 0x32b   : > { %v3473_v63 = vsub.f32 %v3413_v7, %v1851_v6  ;;  %v1852_v57 = vmul.f32 0.03125, %v1828_v55 }
 0x32c   : > { %v1822_v58 = vpop.xlane.xlu0 %1821 }
 0x32d   : > { %v3476_v59 = vsub.f32 %v3415_v38, %v1852_v57  ;;  %v1849_v24 = vmul.f32 0.03125, %v1822_v58  ;;  %v1886_v8 = vsel %vm1879_vm0, %v3473_v63, 0.0 }
 0x32e   : > { %v1824_v60 = vpop.xlane.xlu1 %1823  ;;  %v1902_v62 = vmul.f32 %v1886_v8, %v1886_v8 }
 0x32f   : > { %v3482_v0 = vsub.f32 %v3418_v12, %v1849_v24  ;;  %v1850_v16 = vmul.f32 0.03125, %v1824_v60  ;;  %v1887_v1 = vsel %vm1879_vm0, %v3476_v59, 0.0 }
 0x330   : > { %1924 = vadd.xlane.f32.xlu0 %v1902_v62  ;;  %v1903_v2 = vmul.f32 %v1887_v1, %v1887_v1 }
 0x331   : > { %v3488_v3 = vsub.f32 %v3421_v13, %v1850_v16  ;;  %v1884_v4 = vsel %vm1879_vm0, %v3482_v0, 0.0 }
 0x332   : > { %1926 = vadd.xlane.f32.xlu1 %v1903_v2  ;;  %v1900_v18 = vmul.f32 %v1884_v4, %v1884_v4 }
 0x333   : > { %v1885_v5 = vsel %vm1879_vm0, %v3488_v3, 0.0 }
 0x334   : > { %1920 = vadd.xlane.f32.xlu0 %v1900_v18  ;;  %v1901_v7 = vmul.f32 %v1885_v5, %v1885_v5  ;;  %v3547_v18 = vld [vmem:[%s3677_s5] ss:$0 sm:$0xff] }
 0x336   : > { %1922 = vadd.xlane.f32.xlu1 %v1901_v7 }
 0x338   : > { %v1834_v9 = vpop.xlane.xlu0 %1833 }
 0x339   : > { %v1855_v11 = vmul.f32 0.03125, %v1834_v9  ;;  %v3553_v9 = vld [vmem:[%s3678_s6] ss:$0 sm:$0xff] }
 0x33a   : > { %v1836_v38 = vpop.xlane.xlu1 %1835 }
 0x33b   : > { %v3497_v25 = vsub.f32 %v3425_v15, %v1855_v11  ;;  %v1856_v12 = vmul.f32 0.03125, %v1836_v38 }
 0x33c   : > { %v1830_v13 = vpop.xlane.xlu0 %1829 }
 0x33d   : > { %v3500_v14 = vsub.f32 %v3427_v40, %v1856_v12  ;;  %v1853_v17 = vmul.f32 0.03125, %v1830_v13  ;;  %v1890_v27 = vsel %vm1879_vm0, %v3497_v25, 0.0 }
 0x33e   : > { %v1832_v19 = vpop.xlane.xlu1 %1831  ;;  %v1906_v23 = vmul.f32 %v1890_v27, %v1890_v27 }
 0x33f   : > { %v3506_v26 = vsub.f32 %v3430_v20, %v1853_v17  ;;  %v1854_v29 = vmul.f32 0.03125, %v1832_v19  ;;  %v1891_v15 = vsel %vm1879_vm0, %v3500_v14, 0.0 }
 0x340   : > { %1932 = vadd.xlane.f32.xlu0 %v1906_v23  ;;  %v1907_v30 = vmul.f32 %v1891_v15, %v1891_v15 }
 0x341   : > { %v3512_v40 = vsub.f32 %v3433_v21, %v1854_v29  ;;  %v1888_v43 = vsel %vm1879_vm0, %v3506_v26, 0.0 }
 0x342   : > { %1934 = vadd.xlane.f32.xlu1 %v1907_v30  ;;  %v1904_v35 = vmul.f32 %v1888_v43, %v1888_v43 }
 0x343   : > { %v1889_v20 = vsel %vm1879_vm0, %v3512_v40, 0.0 }
 0x344   : > { %1928 = vadd.xlane.f32.xlu0 %v1904_v35  ;;  %v1905_v54 = vmul.f32 %v1889_v20, %v1889_v20 }
 0x346   : > { %1930 = vadd.xlane.f32.xlu1 %v1905_v54 }
 0x349   : > { %v1838_v36 = vpop.xlane.xlu0 %1837 }
 0x34a   : > { %v1857_v37 = vmul.f32 0.03125, %v1838_v36 }
 0x34b   : > { %v1840_v39 = vpop.xlane.xlu1 %1839 }
 0x34c   : > { %v3521_v56 = vsub.f32 %v3437_v28, %v1857_v37  ;;  %v1858_v21 = vmul.f32 0.03125, %v1840_v39 }
 0x34d   : > { %v1842_v41 = vpop.xlane.xlu0 %1841 }
 0x34e   : > { %v3524_v42 = vsub.f32 %v3439_v31, %v1858_v21  ;;  %v1859_v44 = vmul.f32 0.03125, %v1842_v41  ;;  %v1892_v46 = vsel %vm1879_vm0, %v3521_v56, 0.0 }
 0x34f   : > { %v1844_v48 = vpop.xlane.xlu1 %1843  ;;  %v1908_v50 = vmul.f32 %v1892_v46, %v1892_v46 }
 0x350   : > { %v3530_v51 = vsub.f32 %v3442_v32, %v1859_v44  ;;  %v1860_v52 = vmul.f32 0.03125, %v1844_v48  ;;  %v1893_v28 = vsel %vm1879_vm0, %v3524_v42, 0.0 }
 0x351   : > { %1936 = vadd.xlane.f32.xlu0 %v1908_v50  ;;  %v1909_v61 = vmul.f32 %v1893_v28, %v1893_v28 }
 0x352   : > { %v3536_v31 = vsub.f32 %v3445_v33, %v1860_v52  ;;  %v1894_v22 = vsel %vm1879_vm0, %v3530_v51, 0.0 }
 0x353   : > { %1938 = vadd.xlane.f32.xlu1 %v1909_v61  ;;  %v1910_v53 = vmul.f32 %v1894_v22, %v1894_v22 }
 0x354   : > { %v1895_v32 = vsel %vm1879_vm0, %v3536_v31, 0.0 }
 0x355   : > { %1940 = vadd.xlane.f32.xlu0 %v1910_v53  ;;  %v1911_v6 = vmul.f32 %v1895_v32, %v1895_v32 }
 0x357   : > { %1942 = vadd.xlane.f32.xlu1 %v1911_v6 }
 0x3ad   : > { %v1917_v55 = vpop.xlane.xlu0 %1916 }
 0x3ae   : > { %v1946_v57 = vmul.f32 0.03125, %v1917_v55 }
 0x3b0   : > { %v1962_v58 = vadd.f32 1e-05, %v1946_v57 }
 0x3b1   : > { %v1919_v24 = vpop.xlane.xlu1 %1918  ;;  %v1913_v8 = vpop.xlane.xlu0 %1912 }
 0x3b2   : > { %2819 = vrsqrt.f32 %v1962_v58  ;;  %v1947_v33 = vmul.f32 0.03125, %v1919_v24  ;;  %v1944_v60 = vmul.f32 0.03125, %v1913_v8 }
 0x3b4   : > { %v1963_v62 = vadd.f32 1e-05, %v1947_v33  ;;  %v1960_v16 = vadd.f32 1e-05, %v1944_v60 }
 0x3b5   : > { %v1915_v1 = vpop.xlane.xlu1 %1914 }
 0x3b6   : > { %2821 = vrsqrt.f32 %v1963_v62  ;;  %v1945_v2 = vmul.f32 0.03125, %v1915_v1 }
 0x3b7   : > { %2823 = vrsqrt.f32 %v1960_v16 }
 0x3b8   : > { %v1961_v4 = vadd.f32 1e-05, %v1945_v2 }
 0x3ba   : > { %2825 = vrsqrt.f32 %v1961_v4 }
 0x3bc   : > { %v2820_v34 = vpop.eup %2819 }
 0x3bd   : > { %v1994_v5 = vmul.f32 %v2820_v34, %v3452_v45  ;;  %v1925_v7 = vpop.xlane.xlu0 %1924 }
 0x3be   : > { %v1950_v11 = vmul.f32 0.03125, %v1925_v7 }
 0x3bf   : > { %v2017_v38 = vmul.f32 %v3547_v18, %v1994_v5  ;;  %v1927_v12 = vpop.xlane.xlu1 %1926 }
 0x3c0   : > { %v2822_v13 = vpop.eup %2821  ;;  %v1966_v17 = vadd.f32 1e-05, %v1950_v11  ;;  %v1951_v27 = vmul.f32 0.03125, %v1927_v12 }
 0x3c1   : > { %v2824_v19 = vpop.eup %2823  ;;  %v2040_v23 = vadd.f32 %v3553_v9, %v2017_v38  ;;  %v1995_v29 = vmul.f32 %v2822_v13, %v3459_v47  ;;  %v1921_v15 = vpop.xlane.xlu0 %1920 }
 0x3c2   : > { %v1992_v45 = vmul.f32 %v2824_v19, %v3454_v10  ;;  %2827 = vrsqrt.f32 %v1966_v17  ;;  %v1967_v30 = vadd.f32 1e-05, %v1951_v27  ;;  %v1948_v43 = vmul.f32 0.03125, %v1921_v15 }
 0x3c3   : > { %2829 = vtanh.f32 %v2040_v23  ;;  %v2018_v35 = vmul.f32 %v3547_v18, %v1995_v29  ;;  %v1923_v20 = vpop.xlane.xlu1 %1922 }
 0x3c4   : > { %v2826_v54 = vpop.eup %2825  ;;  %v2015_v36 = vmul.f32 %v3547_v18, %v1992_v45  ;;  %2831 = vrsqrt.f32 %v1967_v30  ;;  %v1964_v37 = vadd.f32 1e-05, %v1948_v43  ;;  %v1949_v39 = vmul.f32 0.03125, %v1923_v20 }
 0x3c5   : > { %v2041_v21 = vadd.f32 %v3553_v9, %v2018_v35  ;;  %v1993_v47 = vmul.f32 %v2826_v54, %v3464_v49 }
 0x3c6   : > { %v2038_v10 = vadd.f32 %v3553_v9, %v2015_v36  ;;  %2833 = vrsqrt.f32 %v1964_v37  ;;  %v1965_v41 = vadd.f32 1e-05, %v1949_v39 }
 0x3c7   : > { %2835 = vtanh.f32 %v2041_v21  ;;  %v2016_v44 = vmul.f32 %v3547_v18, %v1993_v47 }
 0x3c8   : > { %2837 = vtanh.f32 %v2038_v10 }
 0x3c9   : > { %v2039_v46 = vadd.f32 %v3553_v9, %v2016_v44  ;;  %2839 = vrsqrt.f32 %v1965_v41 }
 0x3cb   : > { %2841 = vtanh.f32 %v2039_v46 }
 0x3cc   : > { %v2828_v48 = vpop.eup %2827 }
 0x3cd   : > { %v2830_v50 = vpop.eup %2829  ;;  %v1998_v52 = vmul.f32 %v2828_v48, %v3473_v63  ;;  %v1933_v28 = vpop.xlane.xlu0 %1932 }
 0x3ce   : > { %v2832_v61 = vpop.eup %2831  ;;  %2072 = vst [vmem:[%s3568_s14 + $0x10] sm:$0xff] %v2830_v50  ;;  %v1954_v49 = vmul.f32 0.03125, %v1933_v28 }
 0x3cf   : > { %v2021_v22 = vmul.f32 %v3547_v18, %v1998_v52  ;;  %v1999_v53 = vmul.f32 %v2832_v61, %v3476_v59  ;;  %v1935_v32 = vpop.xlane.xlu1 %1934 }
 0x3d0   : > { %v2834_v6 = vpop.eup %2833  ;;  %v1970_v55 = vadd.f32 1e-05, %v1954_v49  ;;  %v1955_v57 = vmul.f32 0.03125, %v1935_v32 }
 0x3d1   : > { %v2836_v58 = vpop.eup %2835  ;;  %v2044_v63 = vadd.f32 %v3553_v9, %v2021_v22  ;;  %v2022_v24 = vmul.f32 %v3547_v18, %v1999_v53  ;;  %v1996_v8 = vmul.f32 %v2834_v6, %v3482_v0  ;;  %v1929_v33 = vpop.xlane.xlu0 %1928 }
 0x3d2   : > { %v2838_v60 = vpop.eup %2837  ;;  %2073 = vst [vmem:[%s3568_s14 + $0x18] sm:$0xff] %v2836_v58  ;;  %2843 = vrsqrt.f32 %v1970_v55  ;;  %v1971_v62 = vadd.f32 1e-05, %v1955_v57  ;;  %v1952_v16 = vmul.f32 0.03125, %v1929_v33 }
 0x3d3   : > { %v2840_v59 = vpop.eup %2839  ;;  %2070 = vst [vmem:[%s3568_s14] sm:$0xff] %v2838_v60  ;;  %2845 = vtanh.f32 %v2044_v63  ;;  %v2045_v1 = vadd.f32 %v3553_v9, %v2022_v24  ;;  %v2019_v2 = vmul.f32 %v3547_v18, %v1996_v8  ;;  %v1931_v4 = vpop.xlane.xlu1 %1930 }
 0x3d4   : > { %v1997_v34 = vmul.f32 %v2840_v59, %v3488_v3  ;;  %2847 = vrsqrt.f32 %v1971_v62  ;;  %v1968_v5 = vadd.f32 1e-05, %v1952_v16  ;;  %v1953_v0 = vmul.f32 0.03125, %v1931_v4 }
 0x3d5   : > { %v2842_v7 = vpop.eup %2841  ;;  %2849 = vtanh.f32 %v2045_v1  ;;  %v2042_v11 = vadd.f32 %v3553_v9, %v2019_v2 }
 0x3d6   : > { %2071 = vst [vmem:[%s3568_s14 + $0x8] sm:$0xff] %v2842_v7  ;;  %v2020_v38 = vmul.f32 %v3547_v18, %v1997_v34  ;;  %2851 = vrsqrt.f32 %v1968_v5  ;;  %v1969_v12 = vadd.f32 1e-05, %v1953_v0 }
 0x3d7   : > { %2853 = vtanh.f32 %v2042_v11 }
 0x3d8   : > { %v2043_v13 = vadd.f32 %v3553_v9, %v2020_v38  ;;  %2855 = vrsqrt.f32 %v1969_v12 }
 0x3da   : > { %2857 = vtanh.f32 %v2043_v13 }
 0x3dc   : > { %v2844_v3 = vpop.eup %2843 }
 0x3dd   : > { %v2846_v17 = vpop.eup %2845  ;;  %v2002_v27 = vmul.f32 %v2844_v3, %v3497_v25 }
 0x3de   : > { %v2848_v19 = vpop.eup %2847  ;;  %2076 = vst [vmem:[%s3568_s14 + $0x30] sm:$0xff] %v2846_v17  ;;  %v1937_v23 = vpop.xlane.xlu0 %1936 }
 0x3df   : > { %v2850_v29 = vpop.eup %2849  ;;  %v2025_v15 = vmul.f32 %v3547_v18, %v2002_v27  ;;  %v2003_v45 = vmul.f32 %v2848_v19, %v3500_v14  ;;  %v1956_v30 = vmul.f32 0.03125, %v1937_v23 }
 0x3e0   : > { %v2852_v43 = vpop.eup %2851  ;;  %2077 = vst [vmem:[%s3568_s14 + $0x38] sm:$0xff] %v2850_v29  ;;  %v1939_v35 = vpop.xlane.xlu1 %1938 }
 0x3e1   : > { %v2854_v20 = vpop.eup %2853  ;;  %v2048_v54 = vadd.f32 %v3553_v9, %v2025_v15  ;;  %v2026_v36 = vmul.f32 %v3547_v18, %v2003_v45  ;;  %v2000_v25 = vmul.f32 %v2852_v43, %v3506_v26  ;;  %v1972_v37 = vadd.f32 1e-05, %v1956_v30 }
 0x3e2   : > { %v2856_v39 = vpop.eup %2855  ;;  %2074 = vst [vmem:[%s3568_s14 + $0x20] sm:$0xff] %v2854_v20  ;;  %v1957_v21 = vmul.f32 0.03125, %v1939_v35  ;;  %v1941_v47 = vpop.xlane.xlu0 %1940 }
 0x3e3   : > { %2859 = vtanh.f32 %v2048_v54  ;;  %v2049_v14 = vadd.f32 %v3553_v9, %v2026_v36  ;;  %v2023_v10 = vmul.f32 %v3547_v18, %v2000_v25  ;;  %v2001_v41 = vmul.f32 %v2856_v39, %v3512_v40 }
 0x3e4   : > { %v2858_v44 = vpop.eup %2857  ;;  %2861 = vrsqrt.f32 %v1972_v37  ;;  %v1973_v46 = vadd.f32 1e-05, %v1957_v21  ;;  %v1958_v48 = vmul.f32 0.03125, %v1941_v47  ;;  %v1943_v50 = vpop.xlane.xlu1 %1942 }
 0x3e5   : > { %2075 = vst [vmem:[%s3568_s14 + $0x28] sm:$0xff] %v2858_v44  ;;  %2863 = vtanh.f32 %v2049_v14  ;;  %v2046_v26 = vadd.f32 %v3553_v9, %v2023_v10  ;;  %v2024_v52 = vmul.f32 %v3547_v18, %v2001_v41  ;;  %v1959_v28 = vmul.f32 0.03125, %v1943_v50 }
 0x3e6   : > { %2865 = vrsqrt.f32 %v1973_v46  ;;  %v1974_v61 = vadd.f32 1e-05, %v1958_v48 }
 0x3e7   : > { %2867 = vtanh.f32 %v2046_v26  ;;  %v2047_v49 = vadd.f32 %v3553_v9, %v2024_v52  ;;  %v1975_v40 = vadd.f32 1e-05, %v1959_v28 }
 0x3e8   : > { %2869 = vrsqrt.f32 %v1974_v61 }
 0x3e9   : > { %2871 = vtanh.f32 %v2047_v49 }
 0x3ea   : > { %2873 = vrsqrt.f32 %v1975_v40 }
 0x3ed   : > { %v2860_v22 = vpop.eup %2859 }
 0x3ee   : > { %v2862_v53 = vpop.eup %2861  ;;  %2080 = vst [vmem:[%s3568_s14 + $0x50] sm:$0xff] %v2860_v22 }
 0x3ef   : > { %v2864_v32 = vpop.eup %2863  ;;  %v2004_v6 = vmul.f32 %v2862_v53, %v3521_v56 }
 0x3f0   : > { %v2866_v55 = vpop.eup %2865  ;;  %2081 = vst [vmem:[%s3568_s14 + $0x58] sm:$0xff] %v2864_v32 }
 0x3f1   : > { %v2868_v57 = vpop.eup %2867  ;;  %v2027_v58 = vmul.f32 %v3547_v18, %v2004_v6  ;;  %v2005_v63 = vmul.f32 %v2866_v55, %v3524_v42 }
 0x3f2   : > { %v2870_v24 = vpop.eup %2869  ;;  %2078 = vst [vmem:[%s3568_s14 + $0x40] sm:$0xff] %v2868_v57 }
 0x3f3   : > { %v2872_v8 = vpop.eup %2871  ;;  %v2050_v33 = vadd.f32 %v3553_v9, %v2027_v58  ;;  %v2028_v60 = vmul.f32 %v3547_v18, %v2005_v63  ;;  %v2006_v62 = vmul.f32 %v2870_v24, %v3530_v51 }
 0x3f4   : > { %v2874_v56 = vpop.eup %2873  ;;  %2079 = vst [vmem:[%s3568_s14 + $0x48] sm:$0xff] %v2872_v8 }
 0x3f5   : > { %2875 = vtanh.f32 %v2050_v33  ;;  %v2051_v16 = vadd.f32 %v3553_v9, %v2028_v60  ;;  %v2029_v42 = vmul.f32 %v3547_v18, %v2006_v62  ;;  %v2007_v59 = vmul.f32 %v2874_v56, %v3536_v31 }
 0x3f7   : > { %2877 = vtanh.f32 %v2051_v16  ;;  %v2052_v1 = vadd.f32 %v3553_v9, %v2029_v42  ;;  %v2030_v2 = vmul.f32 %v3547_v18, %v2007_v59 }
 0x3f9   : > { %2879 = vtanh.f32 %v2052_v1  ;;  %v2053_v51 = vadd.f32 %v3553_v9, %v2030_v2 }
 0x3fb   : > { %2881 = vtanh.f32 %v2053_v51 }
 0x3ff   : > { %v2876_v4 = vpop.eup %2875 }
 0x400   : > { %2082 = vst [vmem:[%s3568_s14 + $0x60] sm:$0xff] %v2876_v4 }
 0x401   : > { %v2878_v34 = vpop.eup %2877 }
 0x402   : > { %2083 = vst [vmem:[%s3568_s14 + $0x68] sm:$0xff] %v2878_v34 }
 0x403   : > { %v2880_v31 = vpop.eup %2879 }
 0x404   : > { %2084 = vst [vmem:[%s3568_s14 + $0x70] sm:$0xff] %v2880_v31 }
 0x405   : > { %v2882_v18 = vpop.eup %2881 }
 0x406   : > { %2085 = vst [vmem:[%s3568_s14 + $0x78] sm:$0xff] %v2882_v18 }
 0x407   : > { %2982 = shalt.err (!%p2979_p2)
}
 0x408   : > { %s2983_s15 = scalar_lea.hbm %s3624_s9, 2048  ;;  %s2987_s14 = scalar_lea.hbm %s3679_s7, 4096 }
 0x409   : > { %p2984_p13 = scmp.ne.s32.totalorder %s3624_s9, %s2983_s15  ;;  %p2988_p4 = scmp.lt.u32.totalorder %s3624_s9, %s3679_s7 }
 0x40a   : > { %p2989_p5 = scmp.lt.u32.totalorder %s2987_s14, %s2983_s15  ;;  %p2991_p11 = scmp.lt.u32.totalorder %s2983_s15, %s3624_s9 }
 0x40b   : > { %p2985_p6 = pnand %p2984_p13, %p3693_p0 }
 0x40c   : > { %p2990_p8 = por %p2989_p5, %p2988_p4 }
 0x40d   : > { %p2986_p10 = pneg %p2985_p6 }
 0x40e   : > { %p2992_p1 = por %p2991_p11, %p2990_p8 }
 0x410   : > { %p2993_p3 = pnand %p2992_p1, %p2986_p10 }
 0x412   : > { %2996 = shalt.err (!%p2993_p3)
}
 0x413   : > { %s3049_s30 = smov 128   ;;  %s3050_s11 = smov 8  }
 0x414   : > { %2684 = dma.vmem_to_hbm [thread:$0]  (%p3693_p0), %s3626_s18, 2048, %s3624_s9, %s2087_s20, %s3049_s30, %s3049_s30, %s3050_s11  }
 0x415 PF: > { %s2115_s28 = sand.u32 1, %s3027_s24   ;;  %p3694_p7 = scmp.ne.s32.totalorder %s3684_s8, 0 }
 0x416   : > { %p3695_p9 = scmp.ge.s32.totalorder %s3039_s27, 2  ;;  %s2116_s22 = scalar_lea.sflag [#allocation4], %s2115_s28 }
 0x418   : > { %p2698_p12 = pnand %p3695_p9, %p3694_p7 }
 0x41a   : > { %3022 = dma.done.wait (!%p2698_p12), %s2116_s22, 2048  }
 0x41b   : > { %3024 = vsyncadd (!%p2698_p12), %s2116_s22, 4294965248  ;;  %p21_p2 = scmp.ge.s32.totalorder %s3201_s13, 4   ;;  %s3696_s24 = smov %s3031_s25 }
 0x41c   : > { %s3697_s25 = smov %s3035_s26  ;;  %s3698_s26 = smov %s3217_s17 }
 0x41d   : > { %s3699_s27 = smov %s3201_s13  ;;  %23 = sbr.rel (!%p21_p2) target bundleno = 6 (0x6), region = 101 }
 0x424   :  { %2121 = vsyncpa [#allocation3], 1 }
 0x425   :  { %2123 = vsyncpa [#allocation3 + $0x1], 1 }
 0x426   :  { %2124 = vsyncpa [#allocation6], 1 }
 0x427   :  { %2125 = vsyncpa [#allocation4], 1 }
 0x428   :  { %2127 = vsyncpa [#allocation4 + $0x1], 1 }

</bundles_post_ra>
